<compile_context>
chip_gen: v7x
topology: tpu7x:2x2x1
jax: 0.10.0
libtpu: 0.0.40
codegen_flags: <defaults>
</compile_context>

<pallas_src>
import jax
import jax.numpy as jnp
from jax import lax
from jax.experimental import pallas as pl
from jax.experimental.pallas import tpu as pltpu
import numpy as np

VOCAB_SIZE = 64
EMBEDDING_DIM = 32
HIDDEN_DIM_LSTM = 32
NUM_CLASSES = 10
SEQ_LEN = 8

LANE = 128                        # TPU vreg lane width
REP = LANE // HIDDEN_DIM_LSTM     # 4 replicas of each gate fill one vreg
GATE_W = 4 * LANE                 # widened gate vector: one full vreg per gate (i,f,g,o)
B_BLK = 8                         # sequences per grid step = vreg sublane count


def _widen_gate_cols(w):
    """Map gate-major columns (..., 4H) [i|f|g|o] to (..., 4*LANE): each gate's H columns
    are replicated REP times so the gate occupies a full 128-lane vreg, with the 0.5
    pre-scale of sigmoid(x) = 0.5*(1 + tanh(x/2)) folded into the i/f/o columns."""
    H = HIDDEN_DIM_LSTM
    parts = []
    for q, scale in enumerate((0.5, 0.5, 1.0, 0.5)):      # gate order i, f, g, o
        blk = w[..., q * H:(q + 1) * H] * scale
        parts.append(jnp.concatenate([blk] * REP, axis=-1))
    return jnp.concatenate(parts, axis=-1)


def lstm_classifier_kernel(tok_ref, win_ref, whh_ref, bg_ref, wfc_ref, bfc_ref,
                           out_ref, xg_ref):
    T, V, B = SEQ_LEN, VOCAB_SIZE, B_BLK
    cdt = win_ref.dtype            # matmul-operand dtype (bf16 default; f32 = exact path)

    # Hoisted input projection for the whole block: all T steps x 8 sequences of gate
    # pre-activations in one matmul, embedding gather expressed as one_hot @ (emb @ W_ih).
    # tok rows are time-major (row = t*B + b), so per-step reads below are contiguous
    # 8-sublane slices.
    tok = tok_ref[...]                                                    # (T*B, 1) int32
    onehot = (lax.broadcasted_iota(jnp.int32, (T * B, V), 1) == tok).astype(cdt)
    xg_ref[...] = (jnp.dot(onehot, win_ref[...],
                           preferred_element_type=jnp.float32)
                   + bg_ref[...])                                         # (T*B, GATE_W) f32

    whh = whh_ref[...]             # (LANE, GATE_W); rows [H:] are zero (replicated-h layout)
    # h/c carried replicated REP x across lanes (exact because W rows [H:] are zero-padded).
    h = jnp.zeros((B, LANE), jnp.float32)
    c = jnp.zeros((B, LANE), jnp.float32)

    # Static unroll: per step the serial chain is one MXU dot + two tanh + a few VPU ops.
    for t in range(T):
        z = xg_ref[pl.ds(t * B, B), :] + jnp.dot(h.astype(cdt), whh,
                                                 preferred_element_type=jnp.float32)
        th = jnp.tanh(z)                              # all four gate nonlinearities at once
        si = 0.5 * th[:, 0 * LANE:1 * LANE] + 0.5     # sigmoid(i)  (vreg-aligned slices: free)
        sf = 0.5 * th[:, 1 * LANE:2 * LANE] + 0.5     # sigmoid(f)
        tg = th[:, 2 * LANE:3 * LANE]                 # tanh(g)
        so = 0.5 * th[:, 3 * LANE:4 * LANE] + 0.5     # sigmoid(o)
        c = sf * c + si * tg
        h = so * jnp.tanh(c)

    # Lane-dense final linear layer: (8, 128) store, real logits live in cols [0:10).
    out_ref[...] = (jnp.dot(h.astype(cdt), wfc_ref[...],
                            preferred_element_type=jnp.float32)
                    + bfc_ref[...])


def lstm_classifier(tokens, emb_table, w_ih_t, w_hh_t, b_ih, b_hh, w_fc_t, b_fc,
                    *, param_dtype=jnp.bfloat16):
    """Fused forward pass. tokens: (B, T) or (T,) int ids -> (B, NUM_CLASSES) logits,
    matching fc(lstm_out[-1]) applied independently per sequence with zero initial state.
    The parameter widening is one-time prep that would be cached with the weights."""
    H = HIDDEN_DIM_LSTM
    tokens = jnp.asarray(tokens, jnp.int32)
    if tokens.ndim == 1:
        tokens = tokens[None, :]
    B, T = tokens.shape
    assert T == SEQ_LEN

    # --- weight prep (cacheable) ---
    w_in_wide = _widen_gate_cols(jnp.dot(emb_table, w_ih_t)).astype(param_dtype)   # (V, 4*LANE)
    b_wide = _widen_gate_cols((b_ih + b_hh)[None, :]).astype(jnp.float32)          # (1, 4*LANE)
    # NOTE: rows [H:LANE] of W_hh_wide / W_fc_pad MUST remain zero — the replicated-h
    # layout (h carried as 4 copies across 128 lanes) is numerically exact only because
    # those rows contribute nothing to the matmuls.
    w_hh_wide = (jnp.zeros((LANE, GATE_W), jnp.float32)
                 .at[:H, :].set(_widen_gate_cols(w_hh_t)).astype(param_dtype))
    w_fc_pad = (jnp.zeros((LANE, LANE), jnp.float32)
                .at[:H, :NUM_CLASSES].set(w_fc_t).astype(param_dtype))
    b_fc_pad = jnp.zeros((1, LANE), jnp.float32).at[:, :NUM_CLASSES].set(b_fc[None, :])

    # --- batch padding + time-major token layout: row = blk*T*B_BLK + t*B_BLK + b ---
    nb = (B + B_BLK - 1) // B_BLK
    B_pad = nb * B_BLK
    tok_pad = jnp.zeros((B_pad, T), jnp.int32).at[:B].set(tokens)
    tok_tm = (tok_pad.reshape(nb, B_BLK, T).transpose(0, 2, 1)
              .reshape(nb * T * B_BLK, 1))

    grid_spec = pltpu.PrefetchScalarGridSpec(
        num_scalar_prefetch=0,
        grid=(nb,),
        in_specs=[
            pl.BlockSpec((T * B_BLK, 1), lambda blk: (blk, 0)),          # tokens (per block)
            # Constant block index -> weights DMA'd once, VMEM-resident across the grid.
            pl.BlockSpec((VOCAB_SIZE, GATE_W), lambda blk: (0, 0)),      # W_in_wide
            pl.BlockSpec((LANE, GATE_W), lambda blk: (0, 0)),            # W_hh_wide
            pl.BlockSpec((1, GATE_W), lambda blk: (0, 0)),               # b_wide
            pl.BlockSpec((LANE, LANE), lambda blk: (0, 0)),              # W_fc_pad
            pl.BlockSpec((1, LANE), lambda blk: (0, 0)),                 # b_fc_pad
        ],
        out_specs=pl.BlockSpec((B_BLK, LANE), lambda blk: (blk, 0)),
        scratch_shapes=[pltpu.VMEM((SEQ_LEN * B_BLK, GATE_W), jnp.float32)],  # staged xg
    )
    y_full = pl.pallas_call(
        lstm_classifier_kernel,
        out_shape=jax.ShapeDtypeStruct((B_pad, LANE), jnp.float32),
        grid_spec=grid_spec,
        compiler_params=pltpu.CompilerParams(
            dimension_semantics=("parallel",)),    # batch blocks split across TCs on v7x
    )(tok_tm, w_in_wide, w_hh_wide, b_wide, w_fc_pad, b_fc_pad)
    return y_full[:B, :NUM_CLASSES]


def reference_forward(tokens, emb_table, w_ih_t, w_hh_t, b_gates, w_fc_t, b_fc):
    """Pure-JAX reference matching PyTorch nn.LSTM semantics (batch=1, zero init)."""
    H = HIDDEN_DIM_LSTM
    h = jnp.zeros((1, H), jnp.float32)
    c = jnp.zeros((1, H), jnp.float32)
    for t in range(tokens.shape[0]):
        x_t = emb_table[tokens[t]][None, :]
        gates = x_t @ w_ih_t + h @ w_hh_t + b_gates
        i = jax.nn.sigmoid(gates[:, 0 * H:1 * H])
        f = jax.nn.sigmoid(gates[:, 1 * H:2 * H])
        g = jnp.tanh(gates[:, 2 * H:3 * H])
        o = jax.nn.sigmoid(gates[:, 3 * H:4 * H])
        c = f * c + i * g
        h = o * jnp.tanh(c)
    return h @ w_fc_t + b_fc


if __name__ == "__main__":
    key = jax.random.PRNGKey(0)
    k_emb, k_wih, k_whh, k_bih, k_bhh, k_wfc, k_bfc, k_tok = jax.random.split(key, 8)

    H, E, V = HIDDEN_DIM_LSTM, EMBEDDING_DIM, VOCAB_SIZE
    s = 1.0 / np.sqrt(H)  # PyTorch-style uniform init scale

    emb_table = jax.random.normal(k_emb, (V, E), jnp.float32)
    w_ih = jax.random.uniform(k_wih, (4 * H, E), jnp.float32, -s, s)   # torch weight_ih_l0
    w_hh = jax.random.uniform(k_whh, (4 * H, H), jnp.float32, -s, s)   # torch weight_hh_l0
    b_ih = jax.random.uniform(k_bih, (4 * H,), jnp.float32, -s, s)
    b_hh = jax.random.uniform(k_bhh, (4 * H,), jnp.float32, -s, s)
    w_fc = jax.random.uniform(k_wfc, (NUM_CLASSES, H), jnp.float32, -s, s)
    b_fc = jax.random.uniform(k_bfc, (NUM_CLASSES,), jnp.float32, -s, s)

    # Pre-transpose to (in, out) layout so matmuls are x @ W.
    w_ih_t = jnp.transpose(w_ih)                  # (E, 4H)
    w_hh_t = jnp.transpose(w_hh)                  # (H, 4H)
    b_gates = (b_ih + b_hh).reshape(1, 4 * H)     # (1, 4H) — reference only
    w_fc_t = jnp.transpose(w_fc)                  # (H, 10)
    b_fc2 = b_fc.reshape(1, NUM_CLASSES)          # (1, 10) — reference only

    B = 13                                        # non-multiple of 8: exercises padding + 2-block grid
    tokens = jax.random.randint(k_tok, (B, SEQ_LEN), 0, V, jnp.int32)

    # Perf config: bf16 MXU operands, f32 state/accumulation.
    y_bf16 = jax.block_until_ready(
        lstm_classifier(tokens, emb_table, w_ih_t, w_hh_t, b_ih, b_hh, w_fc_t, b_fc))
    # Exact-path config for a tight correctness check.
    y_f32 = jax.block_until_ready(
        lstm_classifier(tokens, emb_table, w_ih_t, w_hh_t, b_ih, b_hh, w_fc_t, b_fc,
                        param_dtype=jnp.float32))
    # Single-sequence call path (matches the original module's forward(sentence) interface).
    y_one = jax.block_until_ready(
        lstm_classifier(tokens[0], emb_table, w_ih_t, w_hh_t, b_ih, b_hh, w_fc_t, b_fc,
                        param_dtype=jnp.float32))

    y_ref = jnp.concatenate(
        [reference_forward(tokens[b], emb_table, w_ih_t, w_hh_t, b_gates, w_fc_t, b_fc2)
         for b in range(B)], axis=0)

    assert y_bf16.shape == (B, NUM_CLASSES)
    assert y_f32.shape == (B, NUM_CLASSES)
    assert y_one.shape == (1, NUM_CLASSES)
    np.testing.assert_allclose(np.asarray(y_f32), np.asarray(y_ref), rtol=2e-4, atol=5e-4)
    np.testing.assert_allclose(np.asarray(y_one), np.asarray(y_ref[:1]), rtol=2e-4, atol=5e-4)
    # bf16 operands round the weights/h at the MXU inputs (state stays f32): relaxed tolerance.
    np.testing.assert_allclose(np.asarray(y_bf16), np.asarray(y_ref), rtol=1e-1, atol=1e-1)

    print("KERNEL_OK")
</pallas_src>

<mosaic_0001>
module attributes {stable_mosaic.version = 11 : i64} {
  func.func @lstm_classifier_kernel(%arg0: i32, %arg1: memref<64x1xi32, #tpu.memory_space<vmem>>, %arg2: memref<64x512xbf16, #tpu.memory_space<vmem>>, %arg3: memref<128x512xbf16, #tpu.memory_space<vmem>>, %arg4: memref<1x512xf32, #tpu.memory_space<vmem>>, %arg5: memref<128x128xbf16, #tpu.memory_space<vmem>>, %arg6: memref<1x128xf32, #tpu.memory_space<vmem>>, %arg7: memref<8x128xf32, #tpu.memory_space<vmem>>, %arg8: memref<64x512xf32, #tpu.memory_space<vmem>>) attributes {dimension_semantics = [#tpu.dimension_semantics<parallel>], iteration_bounds = array<i64: 2>, scalar_prefetch = 0 : i64, scratch_operands = 1 : i64, tpu.core_type = #tpu.core_type<tc>, window_params = [{transform_indices = @transform_0, window_bounds = array<i64: 64, 1>}, {pipeline_mode = #tpu.pipeline_mode<synchronous>, transform_indices = @transform_1, window_bounds = array<i64: 64, 512>}, {pipeline_mode = #tpu.pipeline_mode<synchronous>, transform_indices = @transform_2, window_bounds = array<i64: 128, 512>}, {pipeline_mode = #tpu.pipeline_mode<synchronous>, transform_indices = @transform_3, window_bounds = array<i64: 1, 512>}, {pipeline_mode = #tpu.pipeline_mode<synchronous>, transform_indices = @transform_4, window_bounds = array<i64: 128, 128>}, {pipeline_mode = #tpu.pipeline_mode<synchronous>, transform_indices = @transform_5, window_bounds = array<i64: 1, 128>}, {transform_indices = @transform_6, window_bounds = array<i64: 8, 128>}]} {
    %c0 = arith.constant 0 : index
    %c0_0 = arith.constant 0 : index
    %0 = vector.load %arg1[%c0, %c0_0] : memref<64x1xi32, #tpu.memory_space<vmem>>, vector<64x1xi32>
    %1 = tpu.iota {dimensions = array<i32: 1>} : vector<64x64xi32>
    %2 = vector.broadcast %0 : vector<64x1xi32> to vector<64x64xi32>
    %3 = arith.cmpi eq, %1, %2 : vector<64x64xi32>
    %4 = arith.extui %3 : vector<64x64xi1> to vector<64x64xi32>
    %5 = arith.sitofp %4 : vector<64x64xi32> to vector<64x64xf32>
    %6 = arith.truncf %5 : vector<64x64xf32> to vector<64x64xbf16>
    %c0_1 = arith.constant 0 : index
    %c0_2 = arith.constant 0 : index
    %7 = vector.load %arg2[%c0_1, %c0_2] : memref<64x512xbf16, #tpu.memory_space<vmem>>, vector<64x512xbf16>
    %cst = arith.constant dense<0.000000e+00> : vector<64x512xf32>
    %8 = tpu.matmul %6, %7, %cst {dimension_numbers = #tpu.dot_dimension_numbers<[1], [0], [0], [1], [0, 0, 1, 1], [], []>} : vector<64x64xbf16>, vector<64x512xbf16>, vector<64x512xf32> -> vector<64x512xf32>
    %c0_3 = arith.constant 0 : index
    %c0_4 = arith.constant 0 : index
    %9 = vector.load %arg4[%c0_3, %c0_4] : memref<1x512xf32, #tpu.memory_space<vmem>>, vector<1x512xf32>
    %10 = vector.broadcast %9 : vector<1x512xf32> to vector<64x512xf32>
    %11 = arith.addf %8, %10 : vector<64x512xf32>
    %c0_5 = arith.constant 0 : index
    %c0_6 = arith.constant 0 : index
    %12 = vector.load %arg8[%c0_5, %c0_6] : memref<64x512xf32, #tpu.memory_space<vmem>>, vector<64x512xf32>
    tpu.vector_store %arg8[%c0_5, %c0_6], %11 {strides = array<i32>} : memref<64x512xf32, #tpu.memory_space<vmem>>, vector<64x512xf32>,
    %c0_7 = arith.constant 0 : index
    %c0_8 = arith.constant 0 : index
    %13 = vector.load %arg3[%c0_7, %c0_8] : memref<128x512xbf16, #tpu.memory_space<vmem>>, vector<128x512xbf16>
    %cst_9 = arith.constant 0.000000e+00 : f32
    %14 = vector.broadcast %cst_9 : f32 to vector<8x128xf32>
    %cst_10 = arith.constant 0.000000e+00 : f32
    %15 = vector.broadcast %cst_10 : f32 to vector<8x128xf32>
    %c0_11 = arith.constant 0 : index
    %c0_12 = arith.constant 0 : index
    %16 = vector.load %arg8[%c0_11, %c0_12] : memref<64x512xf32, #tpu.memory_space<vmem>>, vector<8x512xf32>
    %17 = arith.truncf %14 : vector<8x128xf32> to vector<8x128xbf16>
    %cst_13 = arith.constant dense<0.000000e+00> : vector<8x512xf32>
    %18 = tpu.matmul %17, %13, %cst_13 {dimension_numbers = #tpu.dot_dimension_numbers<[1], [0], [0], [1], [0, 0, 1, 1], [], []>} : vector<8x128xbf16>, vector<128x512xbf16>, vector<8x512xf32> -> vector<8x512xf32>
    %19 = arith.addf %16, %18 : vector<8x512xf32>
    %20 = math.tanh %19 : vector<8x512xf32>
    %21 = vector.extract_strided_slice %20 {offsets = [0, 0], sizes = [8, 128], strides = [1, 1]} : vector<8x512xf32> to vector<8x128xf32>
    %cst_14 = arith.constant 5.000000e-01 : f32
    %22 = vector.broadcast %cst_14 : f32 to vector<8x128xf32>
    %23 = arith.mulf %22, %21 : vector<8x128xf32>
    %cst_15 = arith.constant 5.000000e-01 : f32
    %24 = vector.broadcast %cst_15 : f32 to vector<8x128xf32>
    %25 = arith.addf %23, %24 : vector<8x128xf32>
    %26 = vector.extract_strided_slice %20 {offsets = [0, 128], sizes = [8, 128], strides = [1, 1]} : vector<8x512xf32> to vector<8x128xf32>
    %cst_16 = arith.constant 5.000000e-01 : f32
    %27 = vector.broadcast %cst_16 : f32 to vector<8x128xf32>
    %28 = arith.mulf %27, %26 : vector<8x128xf32>
    %cst_17 = arith.constant 5.000000e-01 : f32
    %29 = vector.broadcast %cst_17 : f32 to vector<8x128xf32>
    %30 = arith.addf %28, %29 : vector<8x128xf32>
    %31 = vector.extract_strided_slice %20 {offsets = [0, 256], sizes = [8, 128], strides = [1, 1]} : vector<8x512xf32> to vector<8x128xf32>
    %32 = vector.extract_strided_slice %20 {offsets = [0, 384], sizes = [8, 128], strides = [1, 1]} : vector<8x512xf32> to vector<8x128xf32>
    %cst_18 = arith.constant 5.000000e-01 : f32
    %33 = vector.broadcast %cst_18 : f32 to vector<8x128xf32>
    %34 = arith.mulf %33, %32 : vector<8x128xf32>
    %cst_19 = arith.constant 5.000000e-01 : f32
    %35 = vector.broadcast %cst_19 : f32 to vector<8x128xf32>
    %36 = arith.addf %34, %35 : vector<8x128xf32>
    %37 = arith.mulf %30, %15 : vector<8x128xf32>
    %38 = arith.mulf %25, %31 : vector<8x128xf32>
    %39 = arith.addf %37, %38 : vector<8x128xf32>
    %40 = math.tanh %39 : vector<8x128xf32>
    %41 = arith.mulf %36, %40 : vector<8x128xf32>
    %c8 = arith.constant 8 : index
    %c0_20 = arith.constant 0 : index
    %42 = vector.load %arg8[%c8, %c0_20] : memref<64x512xf32, #tpu.memory_space<vmem>>, vector<8x512xf32>
    %43 = arith.truncf %41 : vector<8x128xf32> to vector<8x128xbf16>
    %cst_21 = arith.constant dense<0.000000e+00> : vector<8x512xf32>
    %44 = tpu.matmul %43, %13, %cst_21 {dimension_numbers = #tpu.dot_dimension_numbers<[1], [0], [0], [1], [0, 0, 1, 1], [], []>} : vector<8x128xbf16>, vector<128x512xbf16>, vector<8x512xf32> -> vector<8x512xf32>
    %45 = arith.addf %42, %44 : vector<8x512xf32>
    %46 = math.tanh %45 : vector<8x512xf32>
    %47 = vector.extract_strided_slice %46 {offsets = [0, 0], sizes = [8, 128], strides = [1, 1]} : vector<8x512xf32> to vector<8x128xf32>
    %cst_22 = arith.constant 5.000000e-01 : f32
    %48 = vector.broadcast %cst_22 : f32 to vector<8x128xf32>
    %49 = arith.mulf %48, %47 : vector<8x128xf32>
    %cst_23 = arith.constant 5.000000e-01 : f32
    %50 = vector.broadcast %cst_23 : f32 to vector<8x128xf32>
    %51 = arith.addf %49, %50 : vector<8x128xf32>
    %52 = vector.extract_strided_slice %46 {offsets = [0, 128], sizes = [8, 128], strides = [1, 1]} : vector<8x512xf32> to vector<8x128xf32>
    %cst_24 = arith.constant 5.000000e-01 : f32
    %53 = vector.broadcast %cst_24 : f32 to vector<8x128xf32>
    %54 = arith.mulf %53, %52 : vector<8x128xf32>
    %cst_25 = arith.constant 5.000000e-01 : f32
    %55 = vector.broadcast %cst_25 : f32 to vector<8x128xf32>
    %56 = arith.addf %54, %55 : vector<8x128xf32>
    %57 = vector.extract_strided_slice %46 {offsets = [0, 256], sizes = [8, 128], strides = [1, 1]} : vector<8x512xf32> to vector<8x128xf32>
    %58 = vector.extract_strided_slice %46 {offsets = [0, 384], sizes = [8, 128], strides = [1, 1]} : vector<8x512xf32> to vector<8x128xf32>
    %cst_26 = arith.constant 5.000000e-01 : f32
    %59 = vector.broadcast %cst_26 : f32 to vector<8x128xf32>
    %60 = arith.mulf %59, %58 : vector<8x128xf32>
    %cst_27 = arith.constant 5.000000e-01 : f32
    %61 = vector.broadcast %cst_27 : f32 to vector<8x128xf32>
    %62 = arith.addf %60, %61 : vector<8x128xf32>
    %63 = arith.mulf %56, %39 : vector<8x128xf32>
    %64 = arith.mulf %51, %57 : vector<8x128xf32>
    %65 = arith.addf %63, %64 : vector<8x128xf32>
    %66 = math.tanh %65 : vector<8x128xf32>
    %67 = arith.mulf %62, %66 : vector<8x128xf32>
    %c16 = arith.constant 16 : index
    %c0_28 = arith.constant 0 : index
    %68 = vector.load %arg8[%c16, %c0_28] : memref<64x512xf32, #tpu.memory_space<vmem>>, vector<8x512xf32>
    %69 = arith.truncf %67 : vector<8x128xf32> to vector<8x128xbf16>
    %cst_29 = arith.constant dense<0.000000e+00> : vector<8x512xf32>
    %70 = tpu.matmul %69, %13, %cst_29 {dimension_numbers = #tpu.dot_dimension_numbers<[1], [0], [0], [1], [0, 0, 1, 1], [], []>} : vector<8x128xbf16>, vector<128x512xbf16>, vector<8x512xf32> -> vector<8x512xf32>
    %71 = arith.addf %68, %70 : vector<8x512xf32>
    %72 = math.tanh %71 : vector<8x512xf32>
    %73 = vector.extract_strided_slice %72 {offsets = [0, 0], sizes = [8, 128], strides = [1, 1]} : vector<8x512xf32> to vector<8x128xf32>
    %cst_30 = arith.constant 5.000000e-01 : f32
    %74 = vector.broadcast %cst_30 : f32 to vector<8x128xf32>
    %75 = arith.mulf %74, %73 : vector<8x128xf32>
    %cst_31 = arith.constant 5.000000e-01 : f32
    %76 = vector.broadcast %cst_31 : f32 to vector<8x128xf32>
    %77 = arith.addf %75, %76 : vector<8x128xf32>
    %78 = vector.extract_strided_slice %72 {offsets = [0, 128], sizes = [8, 128], strides = [1, 1]} : vector<8x512xf32> to vector<8x128xf32>
    %cst_32 = arith.constant 5.000000e-01 : f32
    %79 = vector.broadcast %cst_32 : f32 to vector<8x128xf32>
    %80 = arith.mulf %79, %78 : vector<8x128xf32>
    %cst_33 = arith.constant 5.000000e-01 : f32
    %81 = vector.broadcast %cst_33 : f32 to vector<8x128xf32>
    %82 = arith.addf %80, %81 : vector<8x128xf32>
    %83 = vector.extract_strided_slice %72 {offsets = [0, 256], sizes = [8, 128], strides = [1, 1]} : vector<8x512xf32> to vector<8x128xf32>
    %84 = vector.extract_strided_slice %72 {offsets = [0, 384], sizes = [8, 128], strides = [1, 1]} : vector<8x512xf32> to vector<8x128xf32>
    %cst_34 = arith.constant 5.000000e-01 : f32
    %85 = vector.broadcast %cst_34 : f32 to vector<8x128xf32>
    %86 = arith.mulf %85, %84 : vector<8x128xf32>
    %cst_35 = arith.constant 5.000000e-01 : f32
    %87 = vector.broadcast %cst_35 : f32 to vector<8x128xf32>
    %88 = arith.addf %86, %87 : vector<8x128xf32>
    %89 = arith.mulf %82, %65 : vector<8x128xf32>
    %90 = arith.mulf %77, %83 : vector<8x128xf32>
    %91 = arith.addf %89, %90 : vector<8x128xf32>
    %92 = math.tanh %91 : vector<8x128xf32>
    %93 = arith.mulf %88, %92 : vector<8x128xf32>
    %c24 = arith.constant 24 : index
    %c0_36 = arith.constant 0 : index
    %94 = vector.load %arg8[%c24, %c0_36] : memref<64x512xf32, #tpu.memory_space<vmem>>, vector<8x512xf32>
    %95 = arith.truncf %93 : vector<8x128xf32> to vector<8x128xbf16>
    %cst_37 = arith.constant dense<0.000000e+00> : vector<8x512xf32>
    %96 = tpu.matmul %95, %13, %cst_37 {dimension_numbers = #tpu.dot_dimension_numbers<[1], [0], [0], [1], [0, 0, 1, 1], [], []>} : vector<8x128xbf16>, vector<128x512xbf16>, vector<8x512xf32> -> vector<8x512xf32>
    %97 = arith.addf %94, %96 : vector<8x512xf32>
    %98 = math.tanh %97 : vector<8x512xf32>
    %99 = vector.extract_strided_slice %98 {offsets = [0, 0], sizes = [8, 128], strides = [1, 1]} : vector<8x512xf32> to vector<8x128xf32>
    %cst_38 = arith.constant 5.000000e-01 : f32
    %100 = vector.broadcast %cst_38 : f32 to vector<8x128xf32>
    %101 = arith.mulf %100, %99 : vector<8x128xf32>
    %cst_39 = arith.constant 5.000000e-01 : f32
    %102 = vector.broadcast %cst_39 : f32 to vector<8x128xf32>
    %103 = arith.addf %101, %102 : vector<8x128xf32>
    %104 = vector.extract_strided_slice %98 {offsets = [0, 128], sizes = [8, 128], strides = [1, 1]} : vector<8x512xf32> to vector<8x128xf32>
    %cst_40 = arith.constant 5.000000e-01 : f32
    %105 = vector.broadcast %cst_40 : f32 to vector<8x128xf32>
    %106 = arith.mulf %105, %104 : vector<8x128xf32>
    %cst_41 = arith.constant 5.000000e-01 : f32
    %107 = vector.broadcast %cst_41 : f32 to vector<8x128xf32>
    %108 = arith.addf %106, %107 : vector<8x128xf32>
    %109 = vector.extract_strided_slice %98 {offsets = [0, 256], sizes = [8, 128], strides = [1, 1]} : vector<8x512xf32> to vector<8x128xf32>
    %110 = vector.extract_strided_slice %98 {offsets = [0, 384], sizes = [8, 128], strides = [1, 1]} : vector<8x512xf32> to vector<8x128xf32>
    %cst_42 = arith.constant 5.000000e-01 : f32
    %111 = vector.broadcast %cst_42 : f32 to vector<8x128xf32>
    %112 = arith.mulf %111, %110 : vector<8x128xf32>
    %cst_43 = arith.constant 5.000000e-01 : f32
    %113 = vector.broadcast %cst_43 : f32 to vector<8x128xf32>
    %114 = arith.addf %112, %113 : vector<8x128xf32>
    %115 = arith.mulf %108, %91 : vector<8x128xf32>
    %116 = arith.mulf %103, %109 : vector<8x128xf32>
    %117 = arith.addf %115, %116 : vector<8x128xf32>
    %118 = math.tanh %117 : vector<8x128xf32>
    %119 = arith.mulf %114, %118 : vector<8x128xf32>
    %c32 = arith.constant 32 : index
    %c0_44 = arith.constant 0 : index
    %120 = vector.load %arg8[%c32, %c0_44] : memref<64x512xf32, #tpu.memory_space<vmem>>, vector<8x512xf32>
    %121 = arith.truncf %119 : vector<8x128xf32> to vector<8x128xbf16>
    %cst_45 = arith.constant dense<0.000000e+00> : vector<8x512xf32>
    %122 = tpu.matmul %121, %13, %cst_45 {dimension_numbers = #tpu.dot_dimension_numbers<[1], [0], [0], [1], [0, 0, 1, 1], [], []>} : vector<8x128xbf16>, vector<128x512xbf16>, vector<8x512xf32> -> vector<8x512xf32>
    %123 = arith.addf %120, %122 : vector<8x512xf32>
    %124 = math.tanh %123 : vector<8x512xf32>
    %125 = vector.extract_strided_slice %124 {offsets = [0, 0], sizes = [8, 128], strides = [1, 1]} : vector<8x512xf32> to vector<8x128xf32>
    %cst_46 = arith.constant 5.000000e-01 : f32
    %126 = vector.broadcast %cst_46 : f32 to vector<8x128xf32>
    %127 = arith.mulf %126, %125 : vector<8x128xf32>
    %cst_47 = arith.constant 5.000000e-01 : f32
    %128 = vector.broadcast %cst_47 : f32 to vector<8x128xf32>
    %129 = arith.addf %127, %128 : vector<8x128xf32>
    %130 = vector.extract_strided_slice %124 {offsets = [0, 128], sizes = [8, 128], strides = [1, 1]} : vector<8x512xf32> to vector<8x128xf32>
    %cst_48 = arith.constant 5.000000e-01 : f32
    %131 = vector.broadcast %cst_48 : f32 to vector<8x128xf32>
    %132 = arith.mulf %131, %130 : vector<8x128xf32>
    %cst_49 = arith.constant 5.000000e-01 : f32
    %133 = vector.broadcast %cst_49 : f32 to vector<8x128xf32>
    %134 = arith.addf %132, %133 : vector<8x128xf32>
    %135 = vector.extract_strided_slice %124 {offsets = [0, 256], sizes = [8, 128], strides = [1, 1]} : vector<8x512xf32> to vector<8x128xf32>
    %136 = vector.extract_strided_slice %124 {offsets = [0, 384], sizes = [8, 128], strides = [1, 1]} : vector<8x512xf32> to vector<8x128xf32>
    %cst_50 = arith.constant 5.000000e-01 : f32
    %137 = vector.broadcast %cst_50 : f32 to vector<8x128xf32>
    %138 = arith.mulf %137, %136 : vector<8x128xf32>
    %cst_51 = arith.constant 5.000000e-01 : f32
    %139 = vector.broadcast %cst_51 : f32 to vector<8x128xf32>
    %140 = arith.addf %138, %139 : vector<8x128xf32>
    %141 = arith.mulf %134, %117 : vector<8x128xf32>
    %142 = arith.mulf %129, %135 : vector<8x128xf32>
    %143 = arith.addf %141, %142 : vector<8x128xf32>
    %144 = math.tanh %143 : vector<8x128xf32>
    %145 = arith.mulf %140, %144 : vector<8x128xf32>
    %c40 = arith.constant 40 : index
    %c0_52 = arith.constant 0 : index
    %146 = vector.load %arg8[%c40, %c0_52] : memref<64x512xf32, #tpu.memory_space<vmem>>, vector<8x512xf32>
    %147 = arith.truncf %145 : vector<8x128xf32> to vector<8x128xbf16>
    %cst_53 = arith.constant dense<0.000000e+00> : vector<8x512xf32>
    %148 = tpu.matmul %147, %13, %cst_53 {dimension_numbers = #tpu.dot_dimension_numbers<[1], [0], [0], [1], [0, 0, 1, 1], [], []>} : vector<8x128xbf16>, vector<128x512xbf16>, vector<8x512xf32> -> vector<8x512xf32>
    %149 = arith.addf %146, %148 : vector<8x512xf32>
    %150 = math.tanh %149 : vector<8x512xf32>
    %151 = vector.extract_strided_slice %150 {offsets = [0, 0], sizes = [8, 128], strides = [1, 1]} : vector<8x512xf32> to vector<8x128xf32>
    %cst_54 = arith.constant 5.000000e-01 : f32
    %152 = vector.broadcast %cst_54 : f32 to vector<8x128xf32>
    %153 = arith.mulf %152, %151 : vector<8x128xf32>
    %cst_55 = arith.constant 5.000000e-01 : f32
    %154 = vector.broadcast %cst_55 : f32 to vector<8x128xf32>
    %155 = arith.addf %153, %154 : vector<8x128xf32>
    %156 = vector.extract_strided_slice %150 {offsets = [0, 128], sizes = [8, 128], strides = [1, 1]} : vector<8x512xf32> to vector<8x128xf32>
    %cst_56 = arith.constant 5.000000e-01 : f32
    %157 = vector.broadcast %cst_56 : f32 to vector<8x128xf32>
    %158 = arith.mulf %157, %156 : vector<8x128xf32>
    %cst_57 = arith.constant 5.000000e-01 : f32
    %159 = vector.broadcast %cst_57 : f32 to vector<8x128xf32>
    %160 = arith.addf %158, %159 : vector<8x128xf32>
    %161 = vector.extract_strided_slice %150 {offsets = [0, 256], sizes = [8, 128], strides = [1, 1]} : vector<8x512xf32> to vector<8x128xf32>
    %162 = vector.extract_strided_slice %150 {offsets = [0, 384], sizes = [8, 128], strides = [1, 1]} : vector<8x512xf32> to vector<8x128xf32>
    %cst_58 = arith.constant 5.000000e-01 : f32
    %163 = vector.broadcast %cst_58 : f32 to vector<8x128xf32>
    %164 = arith.mulf %163, %162 : vector<8x128xf32>
    %cst_59 = arith.constant 5.000000e-01 : f32
    %165 = vector.broadcast %cst_59 : f32 to vector<8x128xf32>
    %166 = arith.addf %164, %165 : vector<8x128xf32>
    %167 = arith.mulf %160, %143 : vector<8x128xf32>
    %168 = arith.mulf %155, %161 : vector<8x128xf32>
    %169 = arith.addf %167, %168 : vector<8x128xf32>
    %170 = math.tanh %169 : vector<8x128xf32>
    %171 = arith.mulf %166, %170 : vector<8x128xf32>
    %c48 = arith.constant 48 : index
    %c0_60 = arith.constant 0 : index
    %172 = vector.load %arg8[%c48, %c0_60] : memref<64x512xf32, #tpu.memory_space<vmem>>, vector<8x512xf32>
    %173 = arith.truncf %171 : vector<8x128xf32> to vector<8x128xbf16>
    %cst_61 = arith.constant dense<0.000000e+00> : vector<8x512xf32>
    %174 = tpu.matmul %173, %13, %cst_61 {dimension_numbers = #tpu.dot_dimension_numbers<[1], [0], [0], [1], [0, 0, 1, 1], [], []>} : vector<8x128xbf16>, vector<128x512xbf16>, vector<8x512xf32> -> vector<8x512xf32>
    %175 = arith.addf %172, %174 : vector<8x512xf32>
    %176 = math.tanh %175 : vector<8x512xf32>
    %177 = vector.extract_strided_slice %176 {offsets = [0, 0], sizes = [8, 128], strides = [1, 1]} : vector<8x512xf32> to vector<8x128xf32>
    %cst_62 = arith.constant 5.000000e-01 : f32
    %178 = vector.broadcast %cst_62 : f32 to vector<8x128xf32>
    %179 = arith.mulf %178, %177 : vector<8x128xf32>
    %cst_63 = arith.constant 5.000000e-01 : f32
    %180 = vector.broadcast %cst_63 : f32 to vector<8x128xf32>
    %181 = arith.addf %179, %180 : vector<8x128xf32>
    %182 = vector.extract_strided_slice %176 {offsets = [0, 128], sizes = [8, 128], strides = [1, 1]} : vector<8x512xf32> to vector<8x128xf32>
    %cst_64 = arith.constant 5.000000e-01 : f32
    %183 = vector.broadcast %cst_64 : f32 to vector<8x128xf32>
    %184 = arith.mulf %183, %182 : vector<8x128xf32>
    %cst_65 = arith.constant 5.000000e-01 : f32
    %185 = vector.broadcast %cst_65 : f32 to vector<8x128xf32>
    %186 = arith.addf %184, %185 : vector<8x128xf32>
    %187 = vector.extract_strided_slice %176 {offsets = [0, 256], sizes = [8, 128], strides = [1, 1]} : vector<8x512xf32> to vector<8x128xf32>
    %188 = vector.extract_strided_slice %176 {offsets = [0, 384], sizes = [8, 128], strides = [1, 1]} : vector<8x512xf32> to vector<8x128xf32>
    %cst_66 = arith.constant 5.000000e-01 : f32
    %189 = vector.broadcast %cst_66 : f32 to vector<8x128xf32>
    %190 = arith.mulf %189, %188 : vector<8x128xf32>
    %cst_67 = arith.constant 5.000000e-01 : f32
    %191 = vector.broadcast %cst_67 : f32 to vector<8x128xf32>
    %192 = arith.addf %190, %191 : vector<8x128xf32>
    %193 = arith.mulf %186, %169 : vector<8x128xf32>
    %194 = arith.mulf %181, %187 : vector<8x128xf32>
    %195 = arith.addf %193, %194 : vector<8x128xf32>
    %196 = math.tanh %195 : vector<8x128xf32>
    %197 = arith.mulf %192, %196 : vector<8x128xf32>
    %c56 = arith.constant 56 : index
    %c0_68 = arith.constant 0 : index
    %198 = vector.load %arg8[%c56, %c0_68] : memref<64x512xf32, #tpu.memory_space<vmem>>, vector<8x512xf32>
    %199 = arith.truncf %197 : vector<8x128xf32> to vector<8x128xbf16>
    %cst_69 = arith.constant dense<0.000000e+00> : vector<8x512xf32>
    %200 = tpu.matmul %199, %13, %cst_69 {dimension_numbers = #tpu.dot_dimension_numbers<[1], [0], [0], [1], [0, 0, 1, 1], [], []>} : vector<8x128xbf16>, vector<128x512xbf16>, vector<8x512xf32> -> vector<8x512xf32>
    %201 = arith.addf %198, %200 : vector<8x512xf32>
    %202 = math.tanh %201 : vector<8x512xf32>
    %203 = vector.extract_strided_slice %202 {offsets = [0, 0], sizes = [8, 128], strides = [1, 1]} : vector<8x512xf32> to vector<8x128xf32>
    %cst_70 = arith.constant 5.000000e-01 : f32
    %204 = vector.broadcast %cst_70 : f32 to vector<8x128xf32>
    %205 = arith.mulf %204, %203 : vector<8x128xf32>
    %cst_71 = arith.constant 5.000000e-01 : f32
    %206 = vector.broadcast %cst_71 : f32 to vector<8x128xf32>
    %207 = arith.addf %205, %206 : vector<8x128xf32>
    %208 = vector.extract_strided_slice %202 {offsets = [0, 128], sizes = [8, 128], strides = [1, 1]} : vector<8x512xf32> to vector<8x128xf32>
    %cst_72 = arith.constant 5.000000e-01 : f32
    %209 = vector.broadcast %cst_72 : f32 to vector<8x128xf32>
    %210 = arith.mulf %209, %208 : vector<8x128xf32>
    %cst_73 = arith.constant 5.000000e-01 : f32
    %211 = vector.broadcast %cst_73 : f32 to vector<8x128xf32>
    %212 = arith.addf %210, %211 : vector<8x128xf32>
    %213 = vector.extract_strided_slice %202 {offsets = [0, 256], sizes = [8, 128], strides = [1, 1]} : vector<8x512xf32> to vector<8x128xf32>
    %214 = vector.extract_strided_slice %202 {offsets = [0, 384], sizes = [8, 128], strides = [1, 1]} : vector<8x512xf32> to vector<8x128xf32>
    %cst_74 = arith.constant 5.000000e-01 : f32
    %215 = vector.broadcast %cst_74 : f32 to vector<8x128xf32>
    %216 = arith.mulf %215, %214 : vector<8x128xf32>
    %cst_75 = arith.constant 5.000000e-01 : f32
    %217 = vector.broadcast %cst_75 : f32 to vector<8x128xf32>
    %218 = arith.addf %216, %217 : vector<8x128xf32>
    %219 = arith.mulf %212, %195 : vector<8x128xf32>
    %220 = arith.mulf %207, %213 : vector<8x128xf32>
    %221 = arith.addf %219, %220 : vector<8x128xf32>
    %222 = math.tanh %221 : vector<8x128xf32>
    %223 = arith.mulf %218, %222 : vector<8x128xf32>
    %224 = arith.truncf %223 : vector<8x128xf32> to vector<8x128xbf16>
    %c0_76 = arith.constant 0 : index
    %c0_77 = arith.constant 0 : index
    %225 = vector.load %arg5[%c0_76, %c0_77] : memref<128x128xbf16, #tpu.memory_space<vmem>>, vector<128x128xbf16>
    %cst_78 = arith.constant dense<0.000000e+00> : vector<8x128xf32>
    %226 = tpu.matmul %224, %225, %cst_78 {dimension_numbers = #tpu.dot_dimension_numbers<[1], [0], [0], [1], [0, 0, 1, 1], [], []>} : vector<8x128xbf16>, vector<128x128xbf16>, vector<8x128xf32> -> vector<8x128xf32>
    %c0_79 = arith.constant 0 : index
    %c0_80 = arith.constant 0 : index
    %227 = vector.load %arg6[%c0_79, %c0_80] : memref<1x128xf32, #tpu.memory_space<vmem>>, vector<1x128xf32>
    %228 = vector.broadcast %227 : vector<1x128xf32> to vector<8x128xf32>
    %229 = arith.addf %226, %228 : vector<8x128xf32>
    %c0_81 = arith.constant 0 : index
    %c0_82 = arith.constant 0 : index
    %230 = vector.load %arg7[%c0_81, %c0_82] : memref<8x128xf32, #tpu.memory_space<vmem>>, vector<8x128xf32>
    tpu.vector_store %arg7[%c0_81, %c0_82], %229 {strides = array<i32>} : memref<8x128xf32, #tpu.memory_space<vmem>>, vector<8x128xf32>,
    return
  }
  func.func @transform_0(%arg0: i32) -> (i32, i32) {
    %c0_i32 = arith.constant 0 : i32
    %c0_i32_0 = arith.constant 0 : i32
    return %arg0, %c0_i32 : i32, i32
  }
  func.func @transform_1(%arg0: i32) -> (i32, i32) {
    %c0_i32 = arith.constant 0 : i32
    %c0_i32_0 = arith.constant 0 : i32
    %c0_i32_1 = arith.constant 0 : i32
    return %c0_i32, %c0_i32_0 : i32, i32
  }
  func.func @transform_2(%arg0: i32) -> (i32, i32) {
    %c0_i32 = arith.constant 0 : i32
    %c0_i32_0 = arith.constant 0 : i32
    %c0_i32_1 = arith.constant 0 : i32
    return %c0_i32, %c0_i32_0 : i32, i32
  }
  func.func @transform_3(%arg0: i32) -> (i32, i32) {
    %c0_i32 = arith.constant 0 : i32
    %c0_i32_0 = arith.constant 0 : i32
    %c0_i32_1 = arith.constant 0 : i32
    return %c0_i32, %c0_i32_0 : i32, i32
  }
  func.func @transform_4(%arg0: i32) -> (i32, i32) {
    %c0_i32 = arith.constant 0 : i32
    %c0_i32_0 = arith.constant 0 : i32
    %c0_i32_1 = arith.constant 0 : i32
    return %c0_i32, %c0_i32_0 : i32, i32
  }
  func.func @transform_5(%arg0: i32) -> (i32, i32) {
    %c0_i32 = arith.constant 0 : i32
    %c0_i32_0 = arith.constant 0 : i32
    %c0_i32_1 = arith.constant 0 : i32
    return %c0_i32, %c0_i32_0 : i32, i32
  }
  func.func @transform_6(%arg0: i32) -> (i32, i32) {
    %c0_i32 = arith.constant 0 : i32
    %c0_i32_0 = arith.constant 0 : i32
    return %arg0, %c0_i32 : i32, i32
  }
}

</mosaic_0001>

<bundles_post_ra>
// kernel: tpu_custom_call.1
= control target key start
LH: loop header
LB: loop body
LE: loop exit
PB: predicated region body
PF: predicated region fallthrough
CT: control target
= control target key end

     0   :  { %11 = vsyncpa [#allocation4], 0  ;;  %s3200_s0 = inlined_call_operand.vmem [shape: s32[128,1], index: 0, kind: input, shape index: {}]   ;;  %s3201_s1 = inlined_call_operand.vmem [shape: bf16[64,512], index: 1, kind: input, shape index: {}]   ;;  %s3202_s2 = inlined_call_operand.hbm [shape: bf16[128,512], index: 2, kind: input, shape index: {}]   ;;  %s3203_s3 = inlined_call_operand.vmem [shape: f32[1,512], index: 3, kind: input, shape index: {}]   ;;  %s3204_s4 = inlined_call_operand.hbm [shape: bf16[128,128], index: 4, kind: input, shape index: {}]   ;;  %s3205_s5 = inlined_call_operand.vmem [shape: f32[1,128], index: 5, kind: input, shape index: {}]   ;;  %s3206_s6 = inlined_call_operand.hbm [shape: f32[16,128], index: 6, kind: output, shape index: {}]  }
   0x1   :  { %12 = vsyncpa [#allocation7], 0 }
   0x2   :  { %13 = vsyncpa [#allocation5], 0 }
   0x3   :  { %15 = vsyncpa [#allocation5 + $0x1], 0  ;;  %s2452_s21 = smov 0   ;;  %s2454_s22 = smov 0  }
   0x4   :  { %s2456_s23 = smov 0   ;;  %s2458_s24 = smov 0  }
   0x5 LB: > { %s2473_s25 = sadd.s32 4294967295, %s2405_s24   ;;  %s1901_s26 = sadd.s32 4294967294, %s2405_s24   ;;  %s2405_s24 = sphi %s2458_s24, %s3264_s24   ;;  %s2401_s23 = sphi %s2456_s23, %s3263_s23   ;;  %s2397_s22 = sphi %s2454_s22, %s3262_s22   ;;  %s2393_s21 = sphi %s2452_s21, %s3261_s21  }
   0x6   : > { %s2477_s27 = sadd.s32 1, %s2405_s24   ;;  %s159_s28 = sadd.s32 1, %s2401_s23 }
   0x7   : > { %s156_s29 = ssub.s32 %s2405_s24, %s2477_s27  ;;  %p169_p0 = scmp.ne.s32.totalorder %s2401_s23, %s2397_s22 }
   0x8   : > { %p157_p1 = scmp.eq.s32.totalorder %s156_s29, 0  ;;  %p170_p2 = scmp.eq.s32.totalorder %s2473_s25, 1 }
   0x9   : > { %p175_p3 = scmp.ne.s32.totalorder %s2397_s22, %s2393_s21  ;;  %p176_p4 = scmp.eq.s32.totalorder %s1901_s26, 1 }
   0xa   : > { %s2488_s30 = scalar_select %p157_p1, %s2401_s23, %s159_s28  }
   0xb   : > { %p2490_p5 = por %p170_p2, %p169_p0  ;;  %p2494_p6 = por %p176_p4, %p175_p3 }
   0xc   : > { %p1902_p7 = scmp.ge.s32.totalorder %s2405_s24, 1  ;;  %p183_p8 = scmp.lt.s32.totalorder %s2405_s24, 3 }
   0xd   : > { %s3214_s7 = scalar_select %p2490_p5, 1, 0 }
   0xe   : > { %s3215_s8 = scalar_select %p2494_p6, 1, 0 }
   0xf   : > { %p3207_p9 = scmp.eq.s32.totalorder %s2473_s25, 0  ;;  %p2501_p10 = pnand %p1902_p7, %p183_p8 }
  0x10   : > { %s2407_s10 = smov [#allocation3]   ;;  %s2408_s13 = smov [#allocation6]  }
  0x11   : > { %s3216_s9 = scalar_select %p2501_p10, 1, 0 }
  0x12   : > { %s198_s11 = sshll.u32 %s2407_s10, 4  ;;  %p2028_p11 = pneg %p2501_p10  ;;  %s199_s11 = int_to_ptr.vmem [resolvable:$true] %s198_s11 }
  0x13   : > { %s214_s14 = sshll.u32 %s2408_s13, 4  ;;  %s2279_s17 = scalar_lea.hbm %s3202_s2, 4096  ;;  %s2513_s14 = int_to_ptr.vmem [resolvable:$true] %s214_s14 }
  0x14   : > { %p2509_p12 = pnand %p3207_p9, %p2028_p11  ;;  %p2280_p13 = scmp.ne.s32.totalorder %s3202_s2, %s2279_s17 }
  0x15   : > { %p2286_p3 = scmp.lt.u32.totalorder %s2279_s17, %s3202_s2 }
  0x16   : > { %p2281_p0 = pneg %p2509_p12 }
  0x18   : > { %p2282_p1 = pnand %p2281_p0, %p2280_p13 }
  0x1a   : > { %p2283_p2 = pneg %p2282_p1 }
  0x1c   : > { %p2288_p4 = pnand %p2286_p3, %p2283_p2 }
  0x1e   : > { %2291 = shalt.err (!%p2288_p4)
}
  0x1f   : > { %s2292_s28 = scalar_lea.vmem %s199_s11, 4096  ;;  %p2300_p9 = scmp.lt.s32.totalorder %s199_s11, %s199_s11 }
  0x20   : > { %p2293_p7 = scmp.ne.s32.totalorder %s199_s11, %s2292_s28  ;;  %p2301_p6 = scmp.lt.s32.totalorder %s2292_s28, %s2292_s28 }
  0x22   : > { %p2295_p8 = pnand %p2293_p7, %p2281_p0  ;;  %p2302_p5 = por %p2301_p6, %p2300_p9 }
  0x24   : > { %p2296_p11 = pneg %p2295_p8 }
  0x26   : > { %p2303_p10 = pnand %p2302_p5, %p2296_p11 }
  0x28   : > { %2306 = shalt.err (!%p2303_p10)
}
  0x29   : > { %s2409_s29 = smov 256   ;;  %s2410_s10 = smov 16  }
  0x2a   : > { %2031 = dma.hbm_to_vmem [thread:$0]  (!%p2509_p12), %s3202_s2, 4096, %s199_s11, [#allocation4], %s2409_s29, %s2409_s29, %s2410_s10  }
  0x2b   : > { %s2307_s18 = scalar_lea.hbm %s3204_s4, 1024 }
  0x2c   : > { %p2308_p13 = scmp.ne.s32.totalorder %s3204_s4, %s2307_s18  ;;  %p2314_p9 = scmp.lt.u32.totalorder %s2307_s18, %s3204_s4 }
  0x2e   : > { %p2310_p5 = pnand %p2308_p13, %p2281_p0 }
  0x30   : > { %p2311_p6 = pneg %p2310_p5 }
  0x32   : > { %p2316_p10 = pnand %p2314_p9, %p2311_p6 }
  0x34   : > { %2319 = shalt.err (!%p2316_p10)
}
  0x35   : > { %s2320_s11 = scalar_lea.vmem %s2513_s14, 1024  ;;  %p2328_p4 = scmp.lt.s32.totalorder %s2513_s14, %s2513_s14 }
  0x36   : > { %p2321_p1 = scmp.ne.s32.totalorder %s2513_s14, %s2320_s11  ;;  %p2329_p7 = scmp.lt.s32.totalorder %s2320_s11, %s2320_s11 }
  0x38   : > { %p2323_p2 = pnand %p2321_p1, %p2281_p0  ;;  %p2330_p8 = por %p2329_p7, %p2328_p4 }
  0x3a   : > { %p2324_p3 = pneg %p2323_p2 }
  0x3c   : > { %p2331_p11 = pnand %p2330_p8, %p2324_p3 }
  0x3e   : > { %2334 = shalt.err (!%p2331_p11)
}
  0x3f   : > { %s2411_s29 = smov 64   ;;  %s2412_s10 = smov 4  }
  0x40   : > { %2034 = dma.hbm_to_vmem [thread:$0]  (!%p2509_p12), %s3204_s4, 1024, %s2513_s14, [#allocation7], %s2411_s29, %s2411_s29, %s2412_s10  }
  0x41   : > { %p3218_p13 = scmp.ne.s32.totalorder %s3216_s9, 0 }
  0x43   : > { %242 = sbr.rel (%p3218_p13) target bundleno = 2475 (0x9ab), region = 44 }
  0x4a   : > { %p3219_p0 = scmp.eq.s32.totalorder %s2473_s25, 0 }
  0x4c   : > { %2380 = dma.done.wait (%p3219_p0), [#allocation4], 4096   ;;  %p3220_p5 = pmov %p3219_p0 }
  0x4d   : > { %p3221_p6 = pmov %p3219_p0 }
  0x4e   : > { %2382 = vsyncadd (%p3220_p5), [#allocation4], 4294963200 }
  0x4f   : > { %2384 = dma.done.wait (%p3221_p6), [#allocation7], 1024   ;;  %p3222_p9 = pmov %p3219_p0 }
  0x50   : > { %s1910_s12 = sshll.u32 %s2473_s25, 3  ;;  %v3212_v0 = vmov 0   ;;  %v2087_v5 = vld [vmem:[%s3201_s1 + $0x4] ss:$16 sps:$4 sm:$0xff]   ;;  %v2089_v6 = vld [vmem:[%s3201_s1] ss:$16 sps:$4 sm:$0xff]   ;;  %v291_v27 = vlaneseq }
  0x51   : > { %2386 = vsyncadd (%p3222_p9), [#allocation7], 4294966272  ;;  %2086 = vset.pattern.permute.xlu1 %v3212_v0  ;;  %2085 = vset.pattern.permute.xlu0 %v3212_v0  ;;  %p277_p12 = scmp.lt.s32.totalorder %s1910_s12, 15  ;;  %v2090_v9 = vld [vmem:[%s3201_s1 + $0xc] ss:$16 sps:$4 sm:$0xff]   ;;  %vm463_vm2 = vcmask 523264  }
  0x52   : > { %508 = vmatprep.mubr.bf16.mxu0 %v3212_v0  ;;  %581 = vmatprep.mubr.bf16.mxu1 %v3212_v0  ;;  %v2092_v10 = vld [vmem:[%s3201_s1 + $0x8] ss:$16 sps:$4 sm:$0xff]   ;;  %v2093_v11 = vld [vmem:[%s3201_s1 + $0x24] ss:$16 sps:$4 sm:$0xff]   ;;  %v2095_v12 = vld [vmem:[%s3201_s1 + $0x20] ss:$16 sps:$4 sm:$0xff]  }
  0x53   : > { %s3266_s12 = smov (!%p277_p12, %s1910_s12), 15  ;;  %476 = vmatprep.subr.bf16.mxu0 %v2087_v5  ;;  %549 = vmatprep.subr.bf16.mxu1 %v2090_v9  ;;  %v2096_v13 = vld [vmem:[%s3201_s1 + $0x2c] ss:$16 sps:$4 sm:$0xff]   ;;  %v2098_v14 = vld [vmem:[%s3201_s1 + $0x28] ss:$16 sps:$4 sm:$0xff]   ;;  %v2635_v28 = vand.u32 127, %v291_v27 }
  0x54   : > { %s1911_s9 = sshll.u32 %s3266_s12, 3  ;;  %477 = vmatpush1.bf16.msra.mxu0 %v2089_v6  ;;  %550 = vmatpush1.bf16.msra.mxu1 %v2092_v10  ;;  %v2099_v16 = vld [vmem:[%s3201_s1 + $0x44] ss:$16 sps:$4 sm:$0xff]   ;;  %v2101_v18 = vld [vmem:[%s3201_s1 + $0x40] ss:$16 sps:$4 sm:$0xff]   ;;  %v3210_v32 = vmov 0.0  }
  0x55   : > { %s280_s17 = scalar_lea.vmem %s3200_s0, %s1911_s9  ;;  %478 = vmatprep.subr.bf16.mxu0 %v2093_v11  ;;  %551 = vmatprep.subr.bf16.mxu1 %v2096_v13  ;;  %v2102_v19 = vld [vmem:[%s3201_s1 + $0x4c] ss:$16 sps:$4 sm:$0xff]   ;;  %v2104_v20 = vld [vmem:[%s3201_s1 + $0x48] ss:$16 sps:$4 sm:$0xff]   ;;  %v2105_v21 = vld [vmem:[%s3201_s1 + $0x64] ss:$16 sps:$4 sm:$0xff]  }
  0x56   : > { %v285_v1 = vld [vmem:[%s280_s17 + $0x10] sm:$0xff]  ;;  %v283_v2 = vld [vmem:[%s280_s17] sm:$0xff]  ;;  %v286_v3 = vld [vmem:[%s280_s17 + $0x18] sm:$0xff]  ;;  %vm2415_vm9 = vmmov 0   ;;  %s273_s11 = sand.u32 1, %s2397_s22   ;;  %s1986_s15 = sshll.u32 %s2473_s25, 7 }
  0x57   : > { %300 = vperm.xlu1 %2086, %v285_v1   ;;  %294 = vperm.xlu0 %2085, %v283_v2   ;;  %v284_v4 = vld [vmem:[%s280_s17 + $0x8] sm:$0xff]  ;;  %v287_v8 = vld [vmem:[%s280_s17 + $0x20] sm:$0xff]  ;;  %v290_v15 = vld [vmem:[%s280_s17 + $0x38] sm:$0xff]  ;;  %s1909_s29 = sshll.u32 %s273_s11, 3  ;;  %s3158_s16 = scalar_lea.hbm %s3206_s6, %s1986_s15 }
  0x58   : > { %v288_v7 = vld [vmem:[%s280_s17 + $0x28] sm:$0xff]  ;;  %v289_v17 = vld [vmem:[%s280_s17 + $0x30] sm:$0xff]  ;;  %479 = vmatpush1.bf16.msra.mxu0 %v2095_v12  ;;  %552 = vmatpush1.bf16.msra.mxu1 %v2098_v14  ;;  %s275_s12 = scalar_lea.vmem [#allocation8], %s1909_s29  ;;  %s1807_s18 = scalar_lea.sflag [#allocation5], %s273_s11 }
  0x59   : > { %480 = vmatprep.subr.bf16.mxu0 %v2099_v16  ;;  %553 = vmatprep.subr.bf16.mxu1 %v2102_v19  ;;  %v2108_v22 = vld [vmem:[%s3201_s1 + $0x6c] ss:$16 sps:$4 sm:$0xff]   ;;  %v2107_v23 = vld [vmem:[%s3201_s1 + $0x60] ss:$16 sps:$4 sm:$0xff]   ;;  %v2110_v24 = vld [vmem:[%s3201_s1 + $0x68] ss:$16 sps:$4 sm:$0xff]  }
  0x5a   : > { %v2628_v25 = vld [vmem:[#allocation3 + $0x4] ss:$16 sps:$4 sm:$0xff]   ;;  %v2630_v26 = vld [vmem:[#allocation3 + $0xc] ss:$16 sps:$4 sm:$0xff]   ;;  %v2641_v35 = vld [vmem:[#allocation3] ss:$16 sps:$4 sm:$0xff]  }
  0x5b   : > { %303 = vperm.xlu1 %2086, %v286_v3   ;;  %297 = vperm.xlu0 %2085, %v284_v4   ;;  %v2643_v36 = vld [vmem:[#allocation3 + $0x8] ss:$16 sps:$4 sm:$0xff]   ;;  %v2645_v38 = vld [vmem:[#allocation3 + $0x24] ss:$16 sps:$4 sm:$0xff]   ;;  %v2647_v39 = vld [vmem:[#allocation3 + $0x2c] ss:$16 sps:$4 sm:$0xff]  }
  0x5c   : > { %481 = vmatpush1.bf16.msra.mxu0 %v2101_v18  ;;  %554 = vmatpush1.bf16.msra.mxu1 %v2104_v20  ;;  %v2655_v41 = vld [vmem:[#allocation3 + $0x20] ss:$16 sps:$4 sm:$0xff]   ;;  %v2657_v42 = vld [vmem:[#allocation3 + $0x28] ss:$16 sps:$4 sm:$0xff]   ;;  %v2661_v43 = vld [vmem:[#allocation3 + $0x44] ss:$16 sps:$4 sm:$0xff]  }
  0x5d   : > { %482 = vmatprep.subr.bf16.mxu0 %v2105_v21  ;;  %555 = vmatprep.subr.bf16.mxu1 %v2108_v22  ;;  %v2663_v44 = vld [vmem:[#allocation3 + $0x4c] ss:$16 sps:$4 sm:$0xff]   ;;  %v2671_v49 = vld [vmem:[#allocation3 + $0x40] ss:$16 sps:$4 sm:$0xff]   ;;  %v2673_v50 = vld [vmem:[#allocation3 + $0x48] ss:$16 sps:$4 sm:$0xff]  }
  0x5e   : > { %v2677_v52 = vld [vmem:[#allocation3 + $0x64] ss:$16 sps:$4 sm:$0xff]   ;;  %v2679_v53 = vld [vmem:[#allocation3 + $0x6c] ss:$16 sps:$4 sm:$0xff]   ;;  %v2687_v54 = vld [vmem:[#allocation3 + $0x60] ss:$16 sps:$4 sm:$0xff]  }
  0x5f   : > { %309 = vperm.xlu1 %2086, %v288_v7   ;;  %306 = vperm.xlu0 %2085, %v287_v8   ;;  %v2689_v55 = vld [vmem:[#allocation3 + $0x68] ss:$16 sps:$4 sm:$0xff]   ;;  %v2693_v56 = vld [vmem:[#allocation3 + $0x84] ss:$16 sps:$4 sm:$0xff]   ;;  %v2695_v57 = vld [vmem:[#allocation3 + $0x8c] ss:$16 sps:$4 sm:$0xff]  }
  0x60   : > { %483 = vmatpush1.bf16.msra.mxu0 %v2107_v23  ;;  %556 = vmatpush1.bf16.msra.mxu1 %v2110_v24  ;;  %v2703_v62 = vld [vmem:[#allocation3 + $0x80] ss:$16 sps:$4 sm:$0xff]   ;;  %v2705_v63 = vld [vmem:[#allocation3 + $0x88] ss:$16 sps:$4 sm:$0xff]   ;;  %v2709_v2 = vld [vmem:[#allocation3 + $0xa4] ss:$16 sps:$4 sm:$0xff]  }
  0x61   : > { %850 = vmatprep.subr.bf16.mxu0 %v2628_v25  ;;  %891 = vmatprep.subr.bf16.mxu1 %v2630_v26  ;;  %v2711_v3 = vld [vmem:[#allocation3 + $0xac] ss:$16 sps:$4 sm:$0xff]   ;;  %v2719_v4 = vld [vmem:[#allocation3 + $0xa0] ss:$16 sps:$4 sm:$0xff]   ;;  %v2721_v5 = vld [vmem:[#allocation3 + $0xa8] ss:$16 sps:$4 sm:$0xff]  }
  0x62   : > { %v2725_v6 = vld [vmem:[#allocation3 + $0xc4] ss:$16 sps:$4 sm:$0xff]   ;;  %v2727_v7 = vld [vmem:[#allocation3 + $0xcc] ss:$16 sps:$4 sm:$0xff]   ;;  %v2735_v10 = vld [vmem:[#allocation3 + $0xc0] ss:$16 sps:$4 sm:$0xff]  }
  0x63   : > { %315 = vperm.xlu1 %2086, %v290_v15   ;;  %312 = vperm.xlu0 %2085, %v289_v17   ;;  %v2737_v11 = vld [vmem:[#allocation3 + $0xc8] ss:$16 sps:$4 sm:$0xff]   ;;  %v2741_v13 = vld [vmem:[#allocation3 + $0xe4] ss:$16 sps:$4 sm:$0xff]   ;;  %v2743_v14 = vld [vmem:[#allocation3 + $0xec] ss:$16 sps:$4 sm:$0xff]  }
  0x64   : > { %v2749_v15 = vld [vmem:[#allocation3 + $0xe0] ss:$16 sps:$4 sm:$0xff]   ;;  %v2751_v16 = vld [vmem:[#allocation3 + $0xe8] ss:$16 sps:$4 sm:$0xff]   ;;  %v364_v17 = vshrl.u32 %v291_v27, 7  ;;  %s1820_s9 = sshll.u32 %s275_s12, 4  ;;  %s3160_s9 = int_to_ptr.vmem [resolvable:$true] %s1820_s9 }
  0x65   : > { %v361_v20 = vld [vmem:[%s3203_s3] sm:$0xf]  ;;  %s2335_s25 = scalar_lea.vmem %s3160_s9, 128  ;;  %p3259_p1 = scmp.ne.s32.totalorder %s3214_s7, 0 }
  0x66   : > { %v365_v18 = vsub.s32 0, %v364_v17  ;;  %v373_v19 = vsub.s32 2, %v364_v17  ;;  %v369_v21 = vsub.s32 1, %v364_v17  ;;  %v377_v22 = vsub.s32 3, %v364_v17  ;;  %p2336_p10 = scmp.ne.s32.totalorder %s3160_s9, %s2335_s25  ;;  %s2416_s19 = smov [#allocation8]  }
  0x67   : > { %s2339_s20 = sshll.u32 %s2416_s19, 4  ;;  %s2340_s20 = int_to_ptr.vmem [resolvable:$false] %s2339_s20 }
  0x68   : > { %v366_v23 = vrot.slane %v361_v20, %v365_v18  ;;  %v374_v24 = vrot.slane %v361_v20, %v373_v19  ;;  %p2337_p2 = pnand %p2336_p10, %p3259_p1  ;;  %s2341_s26 = scalar_lea.vmem %s2340_s20, 256 }
  0x69   : > { %p2342_p4 = scmp.lt.s32.totalorder %s3160_s9, %s2340_s20  ;;  %p2343_p7 = scmp.lt.s32.totalorder %s2341_s26, %s2335_s25 }
  0x6a   : > { %p2338_p3 = pneg %p2337_p2 }
  0x6b   : > { %p2344_p8 = por %p2343_p7, %p2342_p4 }
  0x6d   : > { %p2345_p11 = pnand %p2344_p8, %p2338_p3 }
  0xd6   : > { %v295_v29 = vpop.permute.xlu0 %294  ;;  %v301_v30 = vpop.permute.xlu1 %300 }
  0xd7   : > { %vm317_vm0 = vcmp.eq.s32.totalorder %v2635_v28, %v295_v29  ;;  %vm319_vm3 = vcmp.eq.s32.totalorder %v2635_v28, %v301_v30  ;;  %v2803_v29 = vrot.slane %v361_v20, %v377_v22 }
  0xd8   : > { %v1912_v33 = vsel %vm317_vm0, 1.0, %v3210_v32  ;;  %v1914_v45 = vsel %vm319_vm3, 1.0, %v3210_v32 }
  0xda   : > { %v298_v31 = vpop.permute.xlu0 %297  ;;  %v304_v40 = vpop.permute.xlu1 %303 }
  0xdb   : > { %vm318_vm1 = vcmp.eq.s32.totalorder %v2635_v28, %v298_v31  ;;  %vm320_vm4 = vcmp.eq.s32.totalorder %v2635_v28, %v304_v40 }
  0xdc   : > { %v1913_v34 = vsel %vm318_vm1, 1.0, %v3210_v32  ;;  %v1915_v46 = vsel %vm320_vm4, 1.0, %v3210_v32 }
  0xdd   : > { %v341_v37 = vpack.c.bf16 %v1913_v34, %v1912_v33  ;;  %v342_v51 = vpack.c.bf16 %v1915_v46, %v1914_v45 }
  0xde   : > { %v310_v47 = vpop.permute.xlu1 %309  ;;  %v307_v48 = vpop.permute.xlu0 %306 }
  0xdf   : > { %1936 = vmatmul.mubr.msk.bf16.vlgmr.msra.gmra.mrb[0].mxu0 %vm463_vm2, %v341_v37  ;;  %1940 = vmatmul.mubr.msk.bf16.vlgmr.msra.gmra.mrb[0].mxu1 %vm463_vm2, %v341_v37  ;;  %vm322_vm5 = vcmp.eq.s32.totalorder %v2635_v28, %v310_v47  ;;  %vm321_vm6 = vcmp.eq.s32.totalorder %v2635_v28, %v307_v48 }
  0xe0   : > { %851 = vmatpush1.bf16.msra.mxu0 %v2641_v35  ;;  %892 = vmatpush1.bf16.msra.mxu1 %v2643_v36  ;;  %v1917_v58 = vsel %vm322_vm5, 1.0, %v3210_v32  ;;  %v1916_v59 = vsel %vm321_vm6, 1.0, %v3210_v32 }
  0xe1   : > { %852 = vmatprep.subr.bf16.mxu0 %v2645_v38  ;;  %893 = vmatprep.subr.bf16.mxu1 %v2647_v39  ;;  %v343_v1 = vpack.c.bf16 %v1917_v58, %v1916_v59 }
  0xe2   : > { %518 = vmatprep.mubr.bf16.mxu0 %v3212_v0  ;;  %591 = vmatprep.mubr.bf16.mxu1 %v3212_v0  ;;  %v316_v60 = vpop.permute.xlu1 %315  ;;  %v313_v61 = vpop.permute.xlu0 %312 }
  0xe3   : > { %vm324_vm7 = vcmp.eq.s32.totalorder %v2635_v28, %v316_v60  ;;  %vm323_vm8 = vcmp.eq.s32.totalorder %v2635_v28, %v313_v61  ;;  %v2801_v28 = vrot.slane %v361_v20, %v369_v21 }
  0xe4   : > { %853 = vmatpush1.bf16.msra.mxu0 %v2655_v41  ;;  %894 = vmatpush1.bf16.msra.mxu1 %v2657_v42  ;;  %v1919_v8 = vsel %vm324_vm7, 1.0, %v3210_v32  ;;  %v1918_v9 = vsel %vm323_vm8, 1.0, %v3210_v32 }
  0xe5   : > { %854 = vmatprep.subr.bf16.mxu0 %v2661_v43  ;;  %895 = vmatprep.subr.bf16.mxu1 %v2663_v44  ;;  %v344_v12 = vpack.c.bf16 %v1919_v8, %v1918_v9 }
  0xe7   : > { %1937 = vmatmul.mubr.msk.bf16.gmra.mrb[4].mxu0 %vm463_vm2, %v342_v51  ;;  %1941 = vmatmul.mubr.msk.bf16.gmra.mrb[4].mxu1 %vm463_vm2, %v342_v51 }
  0xe8   : > { %855 = vmatpush1.bf16.msra.mxu0 %v2671_v49  ;;  %896 = vmatpush1.bf16.msra.mxu1 %v2673_v50 }
  0xe9   : > { %856 = vmatprep.subr.bf16.mxu0 %v2677_v52  ;;  %897 = vmatprep.subr.bf16.mxu1 %v2679_v53 }
  0xea   : > { %528 = vmatprep.mubr.bf16.mxu0 %v3212_v0  ;;  %601 = vmatprep.mubr.bf16.mxu1 %v3212_v0 }
  0xec   : > { %857 = vmatpush1.bf16.msra.mxu0 %v2687_v54  ;;  %898 = vmatpush1.bf16.msra.mxu1 %v2689_v55 }
  0xed   : > { %858 = vmatprep.subr.bf16.mxu0 %v2693_v56  ;;  %899 = vmatprep.subr.bf16.mxu1 %v2695_v57 }
  0xef   : > { %1938 = vmatmul.mubr.msk.bf16.gmra.mrb[8].mxu0 %vm463_vm2, %v343_v1  ;;  %1942 = vmatmul.mubr.msk.bf16.gmra.mrb[8].mxu1 %vm463_vm2, %v343_v1 }
  0xf0   : > { %859 = vmatpush1.bf16.msra.mxu0 %v2703_v62  ;;  %900 = vmatpush1.bf16.msra.mxu1 %v2705_v63 }
  0xf1   : > { %860 = vmatprep.subr.bf16.mxu0 %v2709_v2  ;;  %901 = vmatprep.subr.bf16.mxu1 %v2711_v3 }
  0xf2   : > { %538 = vmatprep.mubr.bf16.mxu0 %v3212_v0  ;;  %611 = vmatprep.mubr.bf16.mxu1 %v3212_v0 }
  0xf4   : > { %861 = vmatpush1.bf16.msra.mxu0 %v2719_v4  ;;  %902 = vmatpush1.bf16.msra.mxu1 %v2721_v5 }
  0xf5   : > { %862 = vmatprep.subr.bf16.mxu0 %v2725_v6  ;;  %903 = vmatprep.subr.bf16.mxu1 %v2727_v7 }
  0xf7   : > { %1939 = vmatmul.mubr.msk.bf16.gmra.mrb[12].mxu0 %vm463_vm2, %v344_v12  ;;  %1943 = vmatmul.mubr.msk.bf16.gmra.mrb[12].mxu1 %vm463_vm2, %v344_v12 }
  0xf8   : > { %863 = vmatpush1.bf16.msra.mxu0 %v2735_v10  ;;  %904 = vmatpush1.bf16.msra.mxu1 %v2737_v11 }
  0xf9   : > { %864 = vmatprep.subr.bf16.mxu0 %v2741_v13  ;;  %905 = vmatprep.subr.bf16.mxu1 %v2743_v14 }
  0xfa   : > { %882 = vmatprep.mubr.bf16.mxu0 %v3212_v0  ;;  %923 = vmatprep.mubr.bf16.mxu1 %v3212_v0 }
  0xfc   : > { %865 = vmatpush1.bf16.msra.mxu0 %v2749_v15  ;;  %906 = vmatpush1.bf16.msra.mxu1 %v2751_v16 }
  0xfd   : > { %956 = vmatprep.subr.bf16.mxu0 %v2628_v25  ;;  %997 = vmatprep.subr.bf16.mxu1 %v2630_v26 }
  0xff   : > { %883 = vmatmul.mubr.bf16.vlgmr.msra.gmra.mrb[16].mxu0 %v3212_v0  ;;  %924 = vmatmul.mubr.bf16.vlgmr.msra.gmra.mrb[16].mxu1 %v3212_v0 }
 0x100   : > { %957 = vmatpush1.bf16.msra.mxu0 %v2641_v35  ;;  %998 = vmatpush1.bf16.msra.mxu1 %v2643_v36 }
 0x101   : > { %958 = vmatprep.subr.bf16.mxu0 %v2645_v38  ;;  %999 = vmatprep.subr.bf16.mxu1 %v2647_v39 }
 0x102   : > { %988 = vmatprep.mubr.bf16.mxu0 %v3212_v0  ;;  %1029 = vmatprep.mubr.bf16.mxu1 %v3212_v0 }
 0x104   : > { %959 = vmatpush1.bf16.msra.mxu0 %v2655_v41  ;;  %1000 = vmatpush1.bf16.msra.mxu1 %v2657_v42 }
 0x105   : > { %960 = vmatprep.subr.bf16.mxu0 %v2661_v43  ;;  %1001 = vmatprep.subr.bf16.mxu1 %v2663_v44 }
 0x108   : > { %961 = vmatpush1.bf16.msra.mxu0 %v2671_v49  ;;  %1002 = vmatpush1.bf16.msra.mxu1 %v2673_v50 }
 0x109   : > { %962 = vmatprep.subr.bf16.mxu0 %v2677_v52  ;;  %1003 = vmatprep.subr.bf16.mxu1 %v2679_v53 }
 0x10c   : > { %963 = vmatpush1.bf16.msra.mxu0 %v2687_v54  ;;  %1004 = vmatpush1.bf16.msra.mxu1 %v2689_v55 }
 0x10d   : > { %964 = vmatprep.subr.bf16.mxu0 %v2693_v56  ;;  %1005 = vmatprep.subr.bf16.mxu1 %v2695_v57 }
 0x110   : > { %965 = vmatpush1.bf16.msra.mxu0 %v2703_v62  ;;  %1006 = vmatpush1.bf16.msra.mxu1 %v2705_v63 }
 0x111   : > { %966 = vmatprep.subr.bf16.mxu0 %v2709_v2  ;;  %1007 = vmatprep.subr.bf16.mxu1 %v2711_v3 }
 0x114   : > { %967 = vmatpush1.bf16.msra.mxu0 %v2719_v4  ;;  %1008 = vmatpush1.bf16.msra.mxu1 %v2721_v5 }
 0x115   : > { %968 = vmatprep.subr.bf16.mxu0 %v2725_v6  ;;  %1009 = vmatprep.subr.bf16.mxu1 %v2727_v7 }
 0x118   : > { %969 = vmatpush1.bf16.msra.mxu0 %v2735_v10  ;;  %1010 = vmatpush1.bf16.msra.mxu1 %v2737_v11 }
 0x119   : > { %970 = vmatprep.subr.bf16.mxu0 %v2741_v13  ;;  %1011 = vmatprep.subr.bf16.mxu1 %v2743_v14 }
 0x11c   : > { %971 = vmatpush1.bf16.msra.mxu0 %v2749_v15  ;;  %1012 = vmatpush1.bf16.msra.mxu1 %v2751_v16 }
 0x11d   : > { %1062 = vmatprep.subr.bf16.mxu0 %v2628_v25  ;;  %1103 = vmatprep.subr.bf16.mxu1 %v2630_v26 }
 0x1b2   : > { %v510_v30 = vpop.f32.mrb[0].mxu0  ;;  %v583_v31 = vpop.f32.mrb[0].mxu1 }
 0x1b3   : > { %v2805_v33 = vadd.f32 %v510_v30, %v366_v23  ;;  %v2807_v34 = vadd.f32 %v583_v31, %v374_v24  ;;  %v512_v27 = vpop.f32.mrb[1].mxu0  ;;  %v585_v37 = vpop.f32.mrb[1].mxu1 }
 0x1b4   : > { %v2810_v40 = vadd.f32 %v512_v27, %v2801_v28  ;;  %v2813_v45 = vadd.f32 %v585_v37, %v2803_v29  ;;  %v514_v46 = vpop.f32.mrb[2].mxu0  ;;  %v587_v47 = vpop.f32.mrb[2].mxu1 }
 0x1b5   : > { %v2815_v48 = vadd.f32 %v514_v46, %v366_v23  ;;  %v2817_v51 = vadd.f32 %v587_v47, %v374_v24  ;;  %v516_v58 = vpop.f32.mrb[3].mxu0  ;;  %v589_v59 = vpop.f32.mrb[3].mxu1 }
 0x1b6   : > { %v2820_v60 = vadd.f32 %v516_v58, %v2801_v28  ;;  %v2823_v61 = vadd.f32 %v589_v59, %v2803_v29 }
 0x1ba   : > { %v520_v1 = vpop.f32.mrb[4].mxu0  ;;  %v593_v8 = vpop.f32.mrb[4].mxu1 }
 0x1bb   : > { %v2825_v9 = vadd.f32 %v520_v1, %v366_v23  ;;  %v2827_v12 = vadd.f32 %v593_v8, %v374_v24  ;;  %v522_v17 = vpop.f32.mrb[5].mxu0  ;;  %v595_v18 = vpop.f32.mrb[5].mxu1 }
 0x1bc   : > { %v2830_v19 = vadd.f32 %v522_v17, %v2801_v28  ;;  %v2833_v20 = vadd.f32 %v595_v18, %v2803_v29  ;;  %v524_v21 = vpop.f32.mrb[6].mxu0  ;;  %v597_v22 = vpop.f32.mrb[6].mxu1 }
 0x1bd   : > { %v2835_v30 = vadd.f32 %v524_v21, %v366_v23  ;;  %v2837_v31 = vadd.f32 %v597_v22, %v374_v24  ;;  %v526_v27 = vpop.f32.mrb[7].mxu0  ;;  %v599_v37 = vpop.f32.mrb[7].mxu1 }
 0x1be   : > { %v2840_v46 = vadd.f32 %v526_v27, %v2801_v28  ;;  %v2843_v47 = vadd.f32 %v599_v37, %v2803_v29 }
 0x1c0   : > { %3223 = vst [vmem:[#allocation12_spill] sm:$0xff] %v2840_v46  ;;  %3224 = vst [vmem:[#allocation13_spill] sm:$0xff] %v2843_v47 }
 0x1c2   : > { %v530_v58 = vpop.f32.mrb[8].mxu0  ;;  %v603_v59 = vpop.f32.mrb[8].mxu1 }
 0x1c3   : > { %v2845_v1 = vadd.f32 %v530_v58, %v366_v23  ;;  %v2847_v8 = vadd.f32 %v603_v59, %v374_v24  ;;  %v532_v17 = vpop.f32.mrb[9].mxu0  ;;  %v605_v18 = vpop.f32.mrb[9].mxu1 }
 0x1c4   : > { %v2850_v21 = vadd.f32 %v532_v17, %v2801_v28  ;;  %v2853_v22 = vadd.f32 %v605_v18, %v2803_v29  ;;  %v534_v32 = vpop.f32.mrb[10].mxu0  ;;  %v607_v27 = vpop.f32.mrb[10].mxu1 }
 0x1c5   : > { %3225 = vst [vmem:[#allocation14_spill] sm:$0xff] %v2845_v1  ;;  %3226 = vst [vmem:[#allocation15_spill] sm:$0xff] %v2847_v8  ;;  %v2855_v0 = vadd.f32 %v534_v32, %v366_v23  ;;  %v2857_v37 = vadd.f32 %v607_v27, %v374_v24  ;;  %v536_v47 = vpop.f32.mrb[11].mxu0  ;;  %v609_v46 = vpop.f32.mrb[11].mxu1 }
 0x1c6   : > { %3227 = vst [vmem:[#allocation16_spill] sm:$0xff] %v2850_v21  ;;  %3228 = vst [vmem:[#allocation17_spill] sm:$0xff] %v2853_v22  ;;  %v2860_v58 = vadd.f32 %v536_v47, %v2801_v28  ;;  %v2863_v59 = vadd.f32 %v609_v46, %v2803_v29 }
 0x1c7   : > { %3229 = vst [vmem:[#allocation18_spill] sm:$0xff] %v2855_v0  ;;  %3230 = vst [vmem:[#allocation19_spill] sm:$0xff] %v2857_v37 }
 0x1c8   : > { %3231 = vst [vmem:[#allocation20_spill] sm:$0xff] %v2860_v58  ;;  %3232 = vst [vmem:[#allocation21_spill] sm:$0xff] %v2863_v59 }
 0x1ca   : > { %v540_v8 = vpop.f32.mrb[12].mxu0  ;;  %v613_v17 = vpop.f32.mrb[12].mxu1 }
 0x1cb   : > { %v2865_v21 = vadd.f32 %v540_v8, %v366_v23  ;;  %v2867_v18 = vadd.f32 %v613_v17, %v374_v24  ;;  %v542_v22 = vpop.f32.mrb[13].mxu0  ;;  %v615_v1 = vpop.f32.mrb[13].mxu1 }
 0x1cc   : > { %v2870_v32 = vadd.f32 %v542_v22, %v2801_v28  ;;  %v2873_v27 = vadd.f32 %v615_v1, %v2803_v29  ;;  %v544_v37 = vpop.f32.mrb[14].mxu0  ;;  %v617_v47 = vpop.f32.mrb[14].mxu1 }
 0x1cd   : > { %3233 = vst [vmem:[#allocation22_spill] sm:$0xff] %v2865_v21  ;;  %3234 = vst [vmem:[#allocation23_spill] sm:$0xff] %v2867_v18  ;;  %v2875_v58 = vadd.f32 %v544_v37, %v366_v23  ;;  %v2877_v46 = vadd.f32 %v617_v47, %v374_v24  ;;  %v546_v59 = vpop.f32.mrb[15].mxu0  ;;  %v619_v0 = vpop.f32.mrb[15].mxu1 }
 0x1ce   : > { %3235 = vst [vmem:[#allocation24_spill] sm:$0xff] %v2870_v32  ;;  %3236 = vst [vmem:[#allocation25_spill] sm:$0xff] %v2873_v27  ;;  %v2880_v8 = vadd.f32 %v546_v59, %v2801_v28  ;;  %v2883_v17 = vadd.f32 %v619_v0, %v2803_v29 }
 0x1cf   : > { %3237 = vst [vmem:[#allocation26_spill] sm:$0xff] %v2877_v46 }
 0x1d0   : > { %3238 = vst [vmem:[#allocation27_spill] sm:$0xff] %v2880_v8  ;;  %3239 = vst [vmem:[#allocation28_spill] sm:$0xff] %v2883_v17 }
 0x1d2   : > { %v884_v18 = vpop.f32.mrb[16].mxu0  ;;  %v925_v22 = vpop.f32.mrb[16].mxu1 }
 0x1d3   : > { %v932_v32 = vadd.f32 %v884_v18, %v2805_v33  ;;  %v934_v1 = vadd.f32 %v925_v22, %v2807_v34  ;;  %v886_v27 = vpop.f32.mrb[17].mxu0  ;;  %v927_v21 = vpop.f32.mrb[17].mxu1 }
 0x1d4   : > { %v933_v23 = vadd.f32 %v886_v27, %v2810_v40  ;;  %v935_v24 = vadd.f32 %v927_v21, %v2813_v45  ;;  %v888_v37 = vpop.f32.mrb[18].mxu0  ;;  %v929_v47 = vpop.f32.mrb[18].mxu1 }
 0x1d5   : > { %2167 = vtanh.f32 %v932_v32  ;;  %v889_v28 = vpop.f32.mrb[19].mxu0  ;;  %v930_v59 = vpop.f32.mrb[19].mxu1 }
 0x1d6   : > { %2169 = vtanh.f32 %v933_v23 }
 0x1d7   : > { %2171 = vtanh.f32 %v934_v1 }
 0x1d8   : > { %2173 = vtanh.f32 %v935_v24 }
 0x1df   : > { %v2168_v0 = vpop.eup %2167 }
 0x1e0   : > { %v940_v29 = vmul.f32 0.5, %v2168_v0  ;;  %v2170_v17 = vpop.eup %2169 }
 0x1e1   : > { %v942_v33 = vmul.f32 0.5, %v2170_v17  ;;  %v2172_v34 = vpop.eup %2171 }
 0x1e2   : > { %v941_v8 = vadd.f32 0.5, %v940_v29  ;;  %v2174_v45 = vpop.eup %2173 }
 0x1e3   : > { %v943_v18 = vadd.f32 0.5, %v942_v33  ;;  %v944_v21 = vmul.f32 0.5, %v2174_v45 }
 0x1e4   : > { %v947_v22 = vmul.f32 %v2172_v34, %v941_v8 }
 0x1e5   : > { %v946_v46 = vmul.f32 0.0, %v943_v18  ;;  %v945_v32 = vadd.f32 0.5, %v944_v21 }
 0x1e7   : > { %v2889_v40 = vadd.f32 %v947_v22, %v946_v46  ;;  %v3240_v46 = vmov 0  }
 0x1e9   : > { %2175 = vtanh.f32 %v2889_v40 }
 0x1f3   : > { %v2176_v27 = vpop.eup %2175 }
 0x1f4   : > { %v950_v23 = vmul.f32 %v2176_v27, %v945_v32 }
 0x1f6   : > { %v955_v1 = vpack.c.bf16 %v950_v23, %v950_v23 }
 0x1f8   : > { %989 = vmatmul.mubr.bf16.vlgmr.msra.gmra.mrb[20].mxu0 %v955_v1  ;;  %1030 = vmatmul.mubr.bf16.vlgmr.msra.gmra.mrb[20].mxu1 %v955_v1 }
 0x1f9   : > { %1063 = vmatpush1.bf16.msra.mxu0 %v2641_v35  ;;  %1104 = vmatpush1.bf16.msra.mxu1 %v2643_v36 }
 0x1fa   : > { %1064 = vmatprep.subr.bf16.mxu0 %v2645_v38  ;;  %1105 = vmatprep.subr.bf16.mxu1 %v2647_v39 }
 0x1fb   : > { %1094 = vmatprep.mubr.bf16.mxu0 %v3240_v46  ;;  %1135 = vmatprep.mubr.bf16.mxu1 %v3240_v46 }
 0x1fd   : > { %1065 = vmatpush1.bf16.msra.mxu0 %v2655_v41  ;;  %1106 = vmatpush1.bf16.msra.mxu1 %v2657_v42 }
 0x1fe   : > { %1066 = vmatprep.subr.bf16.mxu0 %v2661_v43  ;;  %1107 = vmatprep.subr.bf16.mxu1 %v2663_v44 }
 0x201   : > { %1067 = vmatpush1.bf16.msra.mxu0 %v2671_v49  ;;  %1108 = vmatpush1.bf16.msra.mxu1 %v2673_v50 }
 0x202   : > { %1068 = vmatprep.subr.bf16.mxu0 %v2677_v52  ;;  %1109 = vmatprep.subr.bf16.mxu1 %v2679_v53 }
 0x205   : > { %1069 = vmatpush1.bf16.msra.mxu0 %v2687_v54  ;;  %1110 = vmatpush1.bf16.msra.mxu1 %v2689_v55 }
 0x206   : > { %1070 = vmatprep.subr.bf16.mxu0 %v2693_v56  ;;  %1111 = vmatprep.subr.bf16.mxu1 %v2695_v57 }
 0x209   : > { %1071 = vmatpush1.bf16.msra.mxu0 %v2703_v62  ;;  %1112 = vmatpush1.bf16.msra.mxu1 %v2705_v63 }
 0x20a   : > { %1072 = vmatprep.subr.bf16.mxu0 %v2709_v2  ;;  %1113 = vmatprep.subr.bf16.mxu1 %v2711_v3 }
 0x20d   : > { %1073 = vmatpush1.bf16.msra.mxu0 %v2719_v4  ;;  %1114 = vmatpush1.bf16.msra.mxu1 %v2721_v5 }
 0x20e   : > { %1074 = vmatprep.subr.bf16.mxu0 %v2725_v6  ;;  %1115 = vmatprep.subr.bf16.mxu1 %v2727_v7 }
 0x211   : > { %1075 = vmatpush1.bf16.msra.mxu0 %v2735_v10  ;;  %1116 = vmatpush1.bf16.msra.mxu1 %v2737_v11 }
 0x212   : > { %1076 = vmatprep.subr.bf16.mxu0 %v2741_v13  ;;  %1117 = vmatprep.subr.bf16.mxu1 %v2743_v14 }
 0x215   : > { %1077 = vmatpush1.bf16.msra.mxu0 %v2749_v15  ;;  %1118 = vmatpush1.bf16.msra.mxu1 %v2751_v16 }
 0x216   : > { %1168 = vmatprep.subr.bf16.mxu0 %v2628_v25  ;;  %1209 = vmatprep.subr.bf16.mxu1 %v2630_v26 }
 0x2cb   : > { %v990_v8 = vpop.f32.mrb[20].mxu0  ;;  %v1031_v17 = vpop.f32.mrb[20].mxu1 }
 0x2cc   : > { %v1038_v24 = vadd.f32 %v990_v8, %v2815_v48  ;;  %v1040_v37 = vadd.f32 %v1031_v17, %v2817_v51  ;;  %v992_v47 = vpop.f32.mrb[21].mxu0  ;;  %v1033_v28 = vpop.f32.mrb[21].mxu1 }
 0x2cd   : > { %v1039_v59 = vadd.f32 %v992_v47, %v2820_v60  ;;  %v1041_v0 = vadd.f32 %v1033_v28, %v2823_v61  ;;  %v994_v29 = vpop.f32.mrb[22].mxu0  ;;  %v1035_v33 = vpop.f32.mrb[22].mxu1 }
 0x2ce   : > { %2177 = vtanh.f32 %v1038_v24  ;;  %v995_v34 = vpop.f32.mrb[23].mxu0  ;;  %v1036_v18 = vpop.f32.mrb[23].mxu1 }
 0x2cf   : > { %2179 = vtanh.f32 %v1039_v59 }
 0x2d0   : > { %2181 = vtanh.f32 %v1040_v37 }
 0x2d1   : > { %2183 = vtanh.f32 %v1041_v0 }
 0x2d8   : > { %v2178_v22 = vpop.eup %2177 }
 0x2d9   : > { %v1046_v45 = vmul.f32 0.5, %v2178_v22  ;;  %v2180_v21 = vpop.eup %2179 }
 0x2da   : > { %v1048_v48 = vmul.f32 0.5, %v2180_v21  ;;  %v2182_v51 = vpop.eup %2181 }
 0x2db   : > { %v1047_v32 = vadd.f32 0.5, %v1046_v45  ;;  %v2184_v61 = vpop.eup %2183 }
 0x2dc   : > { %v1049_v27 = vadd.f32 0.5, %v1048_v48  ;;  %v1050_v8 = vmul.f32 0.5, %v2184_v61 }
 0x2dd   : > { %v1053_v23 = vmul.f32 %v2182_v51, %v1047_v32 }
 0x2de   : > { %v1052_v60 = vmul.f32 %v1049_v27, %v2889_v40  ;;  %v1051_v17 = vadd.f32 0.5, %v1050_v8 }
 0x2e0   : > { %v2931_v1 = vadd.f32 %v1053_v23, %v1052_v60 }
 0x2e2   : > { %2185 = vtanh.f32 %v2931_v1 }
 0x2ec   : > { %v2186_v24 = vpop.eup %2185 }
 0x2ed   : > { %v1056_v37 = vmul.f32 %v2186_v24, %v1051_v17 }
 0x2ef   : > { %v1061_v47 = vpack.c.bf16 %v1056_v37, %v1056_v37 }
 0x2f1   : > { %1095 = vmatmul.mubr.bf16.vlgmr.msra.gmra.mrb[24].mxu0 %v1061_v47  ;;  %1136 = vmatmul.mubr.bf16.vlgmr.msra.gmra.mrb[24].mxu1 %v1061_v47 }
 0x2f2   : > { %1169 = vmatpush1.bf16.msra.mxu0 %v2641_v35  ;;  %1210 = vmatpush1.bf16.msra.mxu1 %v2643_v36 }
 0x2f3   : > { %1170 = vmatprep.subr.bf16.mxu0 %v2645_v38  ;;  %1211 = vmatprep.subr.bf16.mxu1 %v2647_v39 }
 0x2f4   : > { %1200 = vmatprep.mubr.bf16.mxu0 %v3240_v46  ;;  %1241 = vmatprep.mubr.bf16.mxu1 %v3240_v46 }
 0x2f6   : > { %1171 = vmatpush1.bf16.msra.mxu0 %v2655_v41  ;;  %1212 = vmatpush1.bf16.msra.mxu1 %v2657_v42 }
 0x2f7   : > { %1172 = vmatprep.subr.bf16.mxu0 %v2661_v43  ;;  %1213 = vmatprep.subr.bf16.mxu1 %v2663_v44 }
 0x2fa   : > { %1173 = vmatpush1.bf16.msra.mxu0 %v2671_v49  ;;  %1214 = vmatpush1.bf16.msra.mxu1 %v2673_v50 }
 0x2fb   : > { %1174 = vmatprep.subr.bf16.mxu0 %v2677_v52  ;;  %1215 = vmatprep.subr.bf16.mxu1 %v2679_v53 }
 0x2fe   : > { %1175 = vmatpush1.bf16.msra.mxu0 %v2687_v54  ;;  %1216 = vmatpush1.bf16.msra.mxu1 %v2689_v55 }
 0x2ff   : > { %1176 = vmatprep.subr.bf16.mxu0 %v2693_v56  ;;  %1217 = vmatprep.subr.bf16.mxu1 %v2695_v57 }
 0x302   : > { %1177 = vmatpush1.bf16.msra.mxu0 %v2703_v62  ;;  %1218 = vmatpush1.bf16.msra.mxu1 %v2705_v63 }
 0x303   : > { %1178 = vmatprep.subr.bf16.mxu0 %v2709_v2  ;;  %1219 = vmatprep.subr.bf16.mxu1 %v2711_v3 }
 0x306   : > { %1179 = vmatpush1.bf16.msra.mxu0 %v2719_v4  ;;  %1220 = vmatpush1.bf16.msra.mxu1 %v2721_v5 }
 0x307   : > { %1180 = vmatprep.subr.bf16.mxu0 %v2725_v6  ;;  %1221 = vmatprep.subr.bf16.mxu1 %v2727_v7 }
 0x30a   : > { %1181 = vmatpush1.bf16.msra.mxu0 %v2735_v10  ;;  %1222 = vmatpush1.bf16.msra.mxu1 %v2737_v11 }
 0x30b   : > { %1182 = vmatprep.subr.bf16.mxu0 %v2741_v13  ;;  %1223 = vmatprep.subr.bf16.mxu1 %v2743_v14 }
 0x30e   : > { %1183 = vmatpush1.bf16.msra.mxu0 %v2749_v15  ;;  %1224 = vmatpush1.bf16.msra.mxu1 %v2751_v16 }
 0x30f   : > { %1274 = vmatprep.subr.bf16.mxu0 %v2628_v25  ;;  %1315 = vmatprep.subr.bf16.mxu1 %v2630_v26 }
 0x3c4   : > { %v1096_v40 = vpop.f32.mrb[24].mxu0  ;;  %v1137_v28 = vpop.f32.mrb[24].mxu1 }
 0x3c5   : > { %v1144_v59 = vadd.f32 %v1096_v40, %v2825_v9  ;;  %v1146_v0 = vadd.f32 %v1137_v28, %v2827_v12  ;;  %v1098_v29 = vpop.f32.mrb[25].mxu0  ;;  %v1139_v33 = vpop.f32.mrb[25].mxu1 }
 0x3c6   : > { %v1145_v34 = vadd.f32 %v1098_v29, %v2830_v19  ;;  %v1147_v18 = vadd.f32 %v1139_v33, %v2833_v20  ;;  %v1100_v22 = vpop.f32.mrb[26].mxu0  ;;  %v1141_v45 = vpop.f32.mrb[26].mxu1 }
 0x3c7   : > { %2187 = vtanh.f32 %v1144_v59  ;;  %v1101_v21 = vpop.f32.mrb[27].mxu0  ;;  %v1142_v32 = vpop.f32.mrb[27].mxu1  ;;  %v3242_v22 = vld [vmem:[#allocation13_spill] sm:$0xff] }
 0x3c8   : > { %2189 = vtanh.f32 %v1145_v34  ;;  %v3241_v34 = vld [vmem:[#allocation12_spill] sm:$0xff] }
 0x3c9   : > { %2191 = vtanh.f32 %v1146_v0 }
 0x3ca   : > { %2193 = vtanh.f32 %v1147_v18 }
 0x3d1   : > { %v2188_v48 = vpop.eup %2187 }
 0x3d2   : > { %v1152_v51 = vmul.f32 0.5, %v2188_v48  ;;  %v2190_v27 = vpop.eup %2189 }
 0x3d3   : > { %v1154_v9 = vmul.f32 0.5, %v2190_v27  ;;  %v2192_v12 = vpop.eup %2191 }
 0x3d4   : > { %v1153_v23 = vadd.f32 0.5, %v1152_v51  ;;  %v2194_v20 = vpop.eup %2193 }
 0x3d5   : > { %v1155_v60 = vadd.f32 0.5, %v1154_v9  ;;  %v1156_v17 = vmul.f32 0.5, %v2194_v20 }
 0x3d6   : > { %v1159_v61 = vmul.f32 %v2192_v12, %v1153_v23 }
 0x3d7   : > { %v1158_v19 = vmul.f32 %v1155_v60, %v2931_v1  ;;  %v1157_v24 = vadd.f32 0.5, %v1156_v17 }
 0x3d9   : > { %v2973_v8 = vadd.f32 %v1159_v61, %v1158_v19 }
 0x3db   : > { %2195 = vtanh.f32 %v2973_v8 }
 0x3e5   : > { %v2196_v37 = vpop.eup %2195 }
 0x3e6   : > { %v1162_v47 = vmul.f32 %v2196_v37, %v1157_v24 }
 0x3e8   : > { %v1167_v40 = vpack.c.bf16 %v1162_v47, %v1162_v47 }
 0x3ea   : > { %1201 = vmatmul.mubr.bf16.vlgmr.msra.gmra.mrb[28].mxu0 %v1167_v40  ;;  %1242 = vmatmul.mubr.bf16.vlgmr.msra.gmra.mrb[28].mxu1 %v1167_v40 }
 0x3eb   : > { %1275 = vmatpush1.bf16.msra.mxu0 %v2641_v35  ;;  %1316 = vmatpush1.bf16.msra.mxu1 %v2643_v36 }
 0x3ec   : > { %1276 = vmatprep.subr.bf16.mxu0 %v2645_v38  ;;  %1317 = vmatprep.subr.bf16.mxu1 %v2647_v39 }
 0x3ed   : > { %1306 = vmatprep.mubr.bf16.mxu0 %v3240_v46  ;;  %1347 = vmatprep.mubr.bf16.mxu1 %v3240_v46 }
 0x3ef   : > { %1277 = vmatpush1.bf16.msra.mxu0 %v2655_v41  ;;  %1318 = vmatpush1.bf16.msra.mxu1 %v2657_v42 }
 0x3f0   : > { %1278 = vmatprep.subr.bf16.mxu0 %v2661_v43  ;;  %1319 = vmatprep.subr.bf16.mxu1 %v2663_v44 }
 0x3f3   : > { %1279 = vmatpush1.bf16.msra.mxu0 %v2671_v49  ;;  %1320 = vmatpush1.bf16.msra.mxu1 %v2673_v50 }
 0x3f4   : > { %1280 = vmatprep.subr.bf16.mxu0 %v2677_v52  ;;  %1321 = vmatprep.subr.bf16.mxu1 %v2679_v53 }
 0x3f7   : > { %1281 = vmatpush1.bf16.msra.mxu0 %v2687_v54  ;;  %1322 = vmatpush1.bf16.msra.mxu1 %v2689_v55 }
 0x3f8   : > { %1282 = vmatprep.subr.bf16.mxu0 %v2693_v56  ;;  %1323 = vmatprep.subr.bf16.mxu1 %v2695_v57 }
 0x3fb   : > { %1283 = vmatpush1.bf16.msra.mxu0 %v2703_v62  ;;  %1324 = vmatpush1.bf16.msra.mxu1 %v2705_v63 }
 0x3fc   : > { %1284 = vmatprep.subr.bf16.mxu0 %v2709_v2  ;;  %1325 = vmatprep.subr.bf16.mxu1 %v2711_v3 }
 0x3ff   : > { %1285 = vmatpush1.bf16.msra.mxu0 %v2719_v4  ;;  %1326 = vmatpush1.bf16.msra.mxu1 %v2721_v5 }
 0x400   : > { %1286 = vmatprep.subr.bf16.mxu0 %v2725_v6  ;;  %1327 = vmatprep.subr.bf16.mxu1 %v2727_v7 }
 0x403   : > { %1287 = vmatpush1.bf16.msra.mxu0 %v2735_v10  ;;  %1328 = vmatpush1.bf16.msra.mxu1 %v2737_v11 }
 0x404   : > { %1288 = vmatprep.subr.bf16.mxu0 %v2741_v13  ;;  %1329 = vmatprep.subr.bf16.mxu1 %v2743_v14 }
 0x407   : > { %1289 = vmatpush1.bf16.msra.mxu0 %v2749_v15  ;;  %1330 = vmatpush1.bf16.msra.mxu1 %v2751_v16 }
 0x408   : > { %1380 = vmatprep.subr.bf16.mxu0 %v2628_v25  ;;  %1421 = vmatprep.subr.bf16.mxu1 %v2630_v26 }
 0x4bd   : > { %v1202_v1 = vpop.f32.mrb[28].mxu0  ;;  %v1243_v28 = vpop.f32.mrb[28].mxu1 }
 0x4be   : > { %v1250_v59 = vadd.f32 %v1202_v1, %v2835_v30  ;;  %v1252_v0 = vadd.f32 %v1243_v28, %v2837_v31  ;;  %v1204_v29 = vpop.f32.mrb[29].mxu0  ;;  %v1245_v33 = vpop.f32.mrb[29].mxu1  ;;  %v3245_v1 = vld [vmem:[#allocation16_spill] sm:$0xff] }
 0x4bf   : > { %v1251_v18 = vadd.f32 %v1204_v29, %v3241_v34  ;;  %v1253_v45 = vadd.f32 %v1245_v33, %v3242_v22  ;;  %v1206_v21 = vpop.f32.mrb[30].mxu0  ;;  %v1247_v32 = vpop.f32.mrb[30].mxu1 }
 0x4c0   : > { %2197 = vtanh.f32 %v1250_v59  ;;  %v1207_v48 = vpop.f32.mrb[31].mxu0  ;;  %v1248_v51 = vpop.f32.mrb[31].mxu1  ;;  %v3246_v59 = vld [vmem:[#allocation17_spill] sm:$0xff] }
 0x4c1   : > { %2199 = vtanh.f32 %v1251_v18 }
 0x4c2   : > { %2201 = vtanh.f32 %v1252_v0 }
 0x4c3   : > { %2203 = vtanh.f32 %v1253_v45 }
 0x4ca   : > { %v2198_v25 = vpop.eup %2197 }
 0x4cb   : > { %v1258_v26 = vmul.f32 0.5, %v2198_v25  ;;  %v2200_v27 = vpop.eup %2199 }
 0x4cc   : > { %v1260_v30 = vmul.f32 0.5, %v2200_v27  ;;  %v2202_v31 = vpop.eup %2201 }
 0x4cd   : > { %v1259_v23 = vadd.f32 0.5, %v1258_v26  ;;  %v2204_v19 = vpop.eup %2203 }
 0x4ce   : > { %v1261_v9 = vadd.f32 0.5, %v1260_v30  ;;  %v1262_v20 = vmul.f32 0.5, %v2204_v19 }
 0x4cf   : > { %v1265_v12 = vmul.f32 %v2202_v31, %v1259_v23 }
 0x4d0   : > { %v1264_v60 = vmul.f32 %v1261_v9, %v2973_v8  ;;  %v1263_v17 = vadd.f32 0.5, %v1262_v20  ;;  %v3064_v20 = vld [vmem:[#allocation3] ss:$16 sps:$4 sm:$0xff]  }
 0x4d2   : > { %v3015_v61 = vadd.f32 %v1265_v12, %v1264_v60 }
 0x4d4   : > { %2205 = vtanh.f32 %v3015_v61 }
 0x4de   : > { %v2206_v24 = vpop.eup %2205 }
 0x4df   : > { %v1268_v37 = vmul.f32 %v2206_v24, %v1263_v17  ;;  %v3067_v17 = vld [vmem:[#allocation3 + $0x8] ss:$16 sps:$4 sm:$0xff]   ;;  %v3073_v24 = vld [vmem:[#allocation3 + $0x2c] ss:$16 sps:$4 sm:$0xff]  }
 0x4e1   : > { %v1273_v47 = vpack.c.bf16 %v1268_v37, %v1268_v37  ;;  %v3078_v37 = vld [vmem:[#allocation3 + $0x20] ss:$16 sps:$4 sm:$0xff]  }
 0x4e3   : > { %1307 = vmatmul.mubr.bf16.vlgmr.msra.gmra.mrb[32].mxu0 %v1273_v47  ;;  %1348 = vmatmul.mubr.bf16.vlgmr.msra.gmra.mrb[32].mxu1 %v1273_v47  ;;  %v3081_v47 = vld [vmem:[#allocation3 + $0x28] ss:$16 sps:$4 sm:$0xff]  }
 0x4e4   : > { %1381 = vmatpush1.bf16.msra.mxu0 %v2641_v35  ;;  %1422 = vmatpush1.bf16.msra.mxu1 %v2643_v36  ;;  %v3050_v35 = vld [vmem:[#allocation3 + $0x4] ss:$16 sps:$4 sm:$0xff]   ;;  %v3053_v36 = vld [vmem:[#allocation3 + $0xc] ss:$16 sps:$4 sm:$0xff]  }
 0x4e5   : > { %1382 = vmatprep.subr.bf16.mxu0 %v2645_v38  ;;  %1423 = vmatprep.subr.bf16.mxu1 %v2647_v39 }
 0x4e6   : > { %1412 = vmatprep.mubr.bf16.mxu0 %v3240_v46  ;;  %1453 = vmatprep.mubr.bf16.mxu1 %v3240_v46 }
 0x4e8   : > { %1383 = vmatpush1.bf16.msra.mxu0 %v2655_v41  ;;  %1424 = vmatpush1.bf16.msra.mxu1 %v2657_v42  ;;  %v3243_v41 = vld [vmem:[#allocation14_spill] sm:$0xff] }
 0x4e9   : > { %1384 = vmatprep.subr.bf16.mxu0 %v2661_v43  ;;  %1425 = vmatprep.subr.bf16.mxu1 %v2663_v44  ;;  %v3244_v43 = vld [vmem:[#allocation15_spill] sm:$0xff] }
 0x4ec   : > { %1385 = vmatpush1.bf16.msra.mxu0 %v2671_v49  ;;  %1426 = vmatpush1.bf16.msra.mxu1 %v2673_v50 }
 0x4ed   : > { %1386 = vmatprep.subr.bf16.mxu0 %v2677_v52  ;;  %1427 = vmatprep.subr.bf16.mxu1 %v2679_v53 }
 0x4f0   : > { %1387 = vmatpush1.bf16.msra.mxu0 %v2687_v54  ;;  %1428 = vmatpush1.bf16.msra.mxu1 %v2689_v55 }
 0x4f1   : > { %1388 = vmatprep.subr.bf16.mxu0 %v2693_v56  ;;  %1429 = vmatprep.subr.bf16.mxu1 %v2695_v57 }
 0x4f4   : > { %1389 = vmatpush1.bf16.msra.mxu0 %v2703_v62  ;;  %1430 = vmatpush1.bf16.msra.mxu1 %v2705_v63 }
 0x4f5   : > { %1390 = vmatprep.subr.bf16.mxu0 %v2709_v2  ;;  %1431 = vmatprep.subr.bf16.mxu1 %v2711_v3 }
 0x4f8   : > { %1391 = vmatpush1.bf16.msra.mxu0 %v2719_v4  ;;  %1432 = vmatpush1.bf16.msra.mxu1 %v2721_v5 }
 0x4f9   : > { %1392 = vmatprep.subr.bf16.mxu0 %v2725_v6  ;;  %1433 = vmatprep.subr.bf16.mxu1 %v2727_v7 }
 0x4fc   : > { %1393 = vmatpush1.bf16.msra.mxu0 %v2735_v10  ;;  %1434 = vmatpush1.bf16.msra.mxu1 %v2737_v11 }
 0x4fd   : > { %1394 = vmatprep.subr.bf16.mxu0 %v2741_v13  ;;  %1435 = vmatprep.subr.bf16.mxu1 %v2743_v14 }
 0x500   : > { %1395 = vmatpush1.bf16.msra.mxu0 %v2749_v15  ;;  %1436 = vmatpush1.bf16.msra.mxu1 %v2751_v16 }
 0x501   : > { %1486 = vmatprep.subr.bf16.mxu0 %v3050_v35  ;;  %1527 = vmatprep.subr.bf16.mxu1 %v3053_v36 }
 0x5b6   : > { %v1308_v38 = vpop.f32.mrb[32].mxu0  ;;  %v1349_v39 = vpop.f32.mrb[32].mxu1 }
 0x5b7   : > { %v1356_v42 = vadd.f32 %v1308_v38, %v3243_v41  ;;  %v1358_v44 = vadd.f32 %v1349_v39, %v3244_v43  ;;  %v1310_v8 = vpop.f32.mrb[33].mxu0  ;;  %v1351_v40 = vpop.f32.mrb[33].mxu1  ;;  %v3084_v38 = vld [vmem:[#allocation3 + $0x44] ss:$16 sps:$4 sm:$0xff]   ;;  %v3087_v39 = vld [vmem:[#allocation3 + $0x4c] ss:$16 sps:$4 sm:$0xff]  }
 0x5b8   : > { %v1357_v28 = vadd.f32 %v1310_v8, %v3245_v1  ;;  %v1359_v0 = vadd.f32 %v1351_v40, %v3246_v59  ;;  %v1312_v29 = vpop.f32.mrb[34].mxu0  ;;  %v1353_v33 = vpop.f32.mrb[34].mxu1  ;;  %v2257_v59 = vld [vmem:[#allocation3 + $0x40] ss:$16 sps:$4 sm:$0xff]  }
 0x5b9   : > { %2207 = vtanh.f32 %v1356_v42  ;;  %v1313_v34 = vpop.f32.mrb[35].mxu0  ;;  %v1354_v18 = vpop.f32.mrb[35].mxu1  ;;  %v2259_v29 = vld [vmem:[#allocation3 + $0x64] ss:$16 sps:$4 sm:$0xff]   ;;  %v2260_v33 = vld [vmem:[#allocation3 + $0x6c] ss:$16 sps:$4 sm:$0xff]  }
 0x5ba   : > { %2209 = vtanh.f32 %v1357_v28  ;;  %v2261_v34 = vld [vmem:[#allocation3 + $0x60] ss:$16 sps:$4 sm:$0xff]   ;;  %v2262_v18 = vld [vmem:[#allocation3 + $0x68] ss:$16 sps:$4 sm:$0xff]  }
 0x5bb   : > { %2211 = vtanh.f32 %v1358_v44 }
 0x5bc   : > { %2213 = vtanh.f32 %v1359_v0  ;;  %v2258_v0 = vld [vmem:[#allocation3 + $0x48] ss:$16 sps:$4 sm:$0xff]  }
 0x5c3   : > { %v2208_v22 = vpop.eup %2207 }
 0x5c4   : > { %v1364_v45 = vmul.f32 0.5, %v2208_v22  ;;  %v2210_v21 = vpop.eup %2209  ;;  %v2264_v22 = vld [vmem:[#allocation3 + $0x8c] ss:$16 sps:$4 sm:$0xff]  }
 0x5c5   : > { %v1366_v48 = vmul.f32 0.5, %v2210_v21  ;;  %v2212_v51 = vpop.eup %2211  ;;  %v2266_v21 = vld [vmem:[#allocation3 + $0x88] ss:$16 sps:$4 sm:$0xff]  }
 0x5c6   : > { %v1365_v32 = vadd.f32 0.5, %v1364_v45  ;;  %v2214_v30 = vpop.eup %2213  ;;  %v2265_v45 = vld [vmem:[#allocation3 + $0x80] ss:$16 sps:$4 sm:$0xff]  }
 0x5c7   : > { %v1367_v25 = vadd.f32 0.5, %v1366_v48  ;;  %v1368_v31 = vmul.f32 0.5, %v2214_v30  ;;  %v2268_v48 = vld [vmem:[#allocation3 + $0xac] ss:$16 sps:$4 sm:$0xff]   ;;  %v2274_v30 = vld [vmem:[#allocation3 + $0xc8] ss:$16 sps:$4 sm:$0xff]  }
 0x5c8   : > { %v1371_v26 = vmul.f32 %v2212_v51, %v1365_v32  ;;  %v2267_v32 = vld [vmem:[#allocation3 + $0xa4] ss:$16 sps:$4 sm:$0xff]   ;;  %v2269_v51 = vld [vmem:[#allocation3 + $0xa0] ss:$16 sps:$4 sm:$0xff]  }
 0x5c9   : > { %v1370_v27 = vmul.f32 %v1367_v25, %v3015_v61  ;;  %v1369_v9 = vadd.f32 0.5, %v1368_v31  ;;  %v3070_v61 = vld [vmem:[#allocation3 + $0x24] ss:$16 sps:$4 sm:$0xff]   ;;  %v2270_v25 = vld [vmem:[#allocation3 + $0xa8] ss:$16 sps:$4 sm:$0xff]  }
 0x5ca   : > { %v2275_v31 = vld [vmem:[#allocation3 + $0xe4] ss:$16 sps:$4 sm:$0xff]  }
 0x5cb   : > { %v3061_v23 = vadd.f32 %v1371_v26, %v1370_v27  ;;  %v2271_v26 = vld [vmem:[#allocation3 + $0xc4] ss:$16 sps:$4 sm:$0xff]   ;;  %v2272_v27 = vld [vmem:[#allocation3 + $0xcc] ss:$16 sps:$4 sm:$0xff]  }
 0x5cd   : > { %2215 = vtanh.f32 %v3061_v23 }
 0x5d7   : > { %v2216_v12 = vpop.eup %2215 }
 0x5d8   : > { %v1374_v60 = vmul.f32 %v2216_v12, %v1369_v9  ;;  %v2276_v9 = vld [vmem:[#allocation3 + $0xec] ss:$16 sps:$4 sm:$0xff]   ;;  %v2277_v12 = vld [vmem:[#allocation3 + $0xe0] ss:$16 sps:$4 sm:$0xff]  }
 0x5da   : > { %v1379_v19 = vpack.c.bf16 %v1374_v60, %v1374_v60  ;;  %v2278_v60 = vld [vmem:[#allocation3 + $0xe8] ss:$16 sps:$4 sm:$0xff]  }
 0x5dc   : > { %1413 = vmatmul.mubr.bf16.vlgmr.msra.gmra.mrb[36].mxu0 %v1379_v19  ;;  %1454 = vmatmul.mubr.bf16.vlgmr.msra.gmra.mrb[36].mxu1 %v1379_v19  ;;  %v3251_v19 = vmov 0.0  }
 0x5dd   : > { %1487 = vmatpush1.bf16.msra.mxu0 %v3064_v20  ;;  %1528 = vmatpush1.bf16.msra.mxu1 %v3067_v17 }
 0x5de   : > { %1488 = vmatprep.subr.bf16.mxu0 %v3070_v61  ;;  %1529 = vmatprep.subr.bf16.mxu1 %v3073_v24 }
 0x5df   : > { %1518 = vmatprep.mubr.bf16.mxu0 %v3240_v46  ;;  %1559 = vmatprep.mubr.bf16.mxu1 %v3240_v46 }
 0x5e1   : > { %1489 = vmatpush1.bf16.msra.mxu0 %v3078_v37  ;;  %1530 = vmatpush1.bf16.msra.mxu1 %v3081_v47 }
 0x5e2   : > { %1490 = vmatprep.subr.bf16.mxu0 %v3084_v38  ;;  %1531 = vmatprep.subr.bf16.mxu1 %v3087_v39 }
 0x5e5   : > { %1491 = vmatpush1.bf16.msra.mxu0 %v2671_v49  ;;  %1532 = vmatpush1.bf16.msra.mxu1 %v2673_v50 }
 0x5e6   : > { %1492 = vmatprep.subr.bf16.mxu0 %v2677_v52  ;;  %1533 = vmatprep.subr.bf16.mxu1 %v2679_v53  ;;  %v3247_v52 = vld [vmem:[#allocation18_spill] sm:$0xff] }
 0x5e9   : > { %1493 = vmatpush1.bf16.msra.mxu0 %v2687_v54  ;;  %1534 = vmatpush1.bf16.msra.mxu1 %v2689_v55  ;;  %v3248_v54 = vld [vmem:[#allocation19_spill] sm:$0xff] }
 0x5ea   : > { %1494 = vmatprep.subr.bf16.mxu0 %v2693_v56  ;;  %1535 = vmatprep.subr.bf16.mxu1 %v2695_v57 }
 0x5ed   : > { %1495 = vmatpush1.bf16.msra.mxu0 %v2703_v62  ;;  %1536 = vmatpush1.bf16.msra.mxu1 %v2705_v63  ;;  %v3249_v62 = vld [vmem:[#allocation20_spill] sm:$0xff] }
 0x5ee   : > { %1496 = vmatprep.subr.bf16.mxu0 %v2709_v2  ;;  %1537 = vmatprep.subr.bf16.mxu1 %v2711_v3  ;;  %v3250_v2 = vld [vmem:[#allocation21_spill] sm:$0xff] }
 0x5f1   : > { %1497 = vmatpush1.bf16.msra.mxu0 %v2719_v4  ;;  %1538 = vmatpush1.bf16.msra.mxu1 %v2721_v5 }
 0x5f2   : > { %1498 = vmatprep.subr.bf16.mxu0 %v2725_v6  ;;  %1539 = vmatprep.subr.bf16.mxu1 %v2727_v7 }
 0x5f5   : > { %1499 = vmatpush1.bf16.msra.mxu0 %v2735_v10  ;;  %1540 = vmatpush1.bf16.msra.mxu1 %v2737_v11 }
 0x5f6   : > { %1500 = vmatprep.subr.bf16.mxu0 %v2741_v13  ;;  %1541 = vmatprep.subr.bf16.mxu1 %v2743_v14 }
 0x5f9   : > { %1501 = vmatpush1.bf16.msra.mxu0 %v2749_v15  ;;  %1542 = vmatpush1.bf16.msra.mxu1 %v2751_v16 }
 0x5fa   : > { %1592 = vmatprep.subr.bf16.mxu0 %v3050_v35  ;;  %1633 = vmatprep.subr.bf16.mxu1 %v3053_v36 }
 0x6af   : > { %v1414_v49 = vpop.f32.mrb[36].mxu0  ;;  %v1455_v50 = vpop.f32.mrb[36].mxu1 }
 0x6b0   : > { %v1462_v53 = vadd.f32 %v1414_v49, %v3247_v52  ;;  %v1464_v55 = vadd.f32 %v1455_v50, %v3248_v54  ;;  %v1416_v56 = vpop.f32.mrb[37].mxu0  ;;  %v1457_v57 = vpop.f32.mrb[37].mxu1  ;;  %v3254_v49 = vld [vmem:[#allocation24_spill] sm:$0xff]  ;;  %v3255_v52 = vld [vmem:[#allocation25_spill] sm:$0xff] }
 0x6b1   : > { %v1463_v63 = vadd.f32 %v1416_v56, %v3249_v62  ;;  %v1465_v3 = vadd.f32 %v1457_v57, %v3250_v2  ;;  %v1418_v4 = vpop.f32.mrb[38].mxu0  ;;  %v1459_v5 = vpop.f32.mrb[38].mxu1 }
 0x6b2   : > { %2217 = vtanh.f32 %v1462_v53  ;;  %v1419_v6 = vpop.f32.mrb[39].mxu0  ;;  %v1460_v7 = vpop.f32.mrb[39].mxu1 }
 0x6b3   : > { %2219 = vtanh.f32 %v1463_v63 }
 0x6b4   : > { %2221 = vtanh.f32 %v1464_v55 }
 0x6b5   : > { %2223 = vtanh.f32 %v1465_v3 }
 0x6bc   : > { %v2218_v10 = vpop.eup %2217 }
 0x6bd   : > { %v1470_v11 = vmul.f32 0.5, %v2218_v10  ;;  %v2220_v13 = vpop.eup %2219 }
 0x6be   : > { %v1472_v15 = vmul.f32 0.5, %v2220_v13  ;;  %v2222_v16 = vpop.eup %2221 }
 0x6bf   : > { %v1471_v14 = vadd.f32 0.5, %v1470_v11  ;;  %v2224_v43 = vpop.eup %2223 }
 0x6c0   : > { %v1473_v35 = vadd.f32 0.5, %v1472_v15  ;;  %v1474_v44 = vmul.f32 0.5, %v2224_v43  ;;  %v2160_v43 = vld [vmem:[#allocation6 + $0x8] sm:$0xff]  }
 0x6c1   : > { %v1477_v36 = vmul.f32 %v2222_v16, %v1471_v14 }
 0x6c2   : > { %v1476_v41 = vmul.f32 %v1473_v35, %v3061_v23  ;;  %v1475_v8 = vadd.f32 0.5, %v1474_v44  ;;  %v2273_v23 = vld [vmem:[#allocation3 + $0xc0] ss:$16 sps:$4 sm:$0xff]  }
 0x6c3   : > { %v2161_v44 = vld [vmem:[#allocation6 + $0x10] sm:$0xff]  }
 0x6c4   : > { %v3119_v42 = vadd.f32 %v1477_v36, %v1476_v41  ;;  %v2159_v41 = vld [vmem:[#allocation6] sm:$0xff]  }
 0x6c6   : > { %2225 = vtanh.f32 %v3119_v42 }
 0x6d0   : > { %v2226_v40 = vpop.eup %2225 }
 0x6d1   : > { %v1480_v1 = vmul.f32 %v2226_v40, %v1475_v8  ;;  %v2163_v8 = vld [vmem:[#allocation6 + $0x20] sm:$0xff]   ;;  %v2164_v40 = vld [vmem:[#allocation6 + $0x28] sm:$0xff]  }
 0x6d3   : > { %v1485_v28 = vpack.c.bf16 %v1480_v1, %v1480_v1  ;;  %v2165_v1 = vld [vmem:[#allocation6 + $0x30] sm:$0xff]  }
 0x6d5   : > { %1519 = vmatmul.mubr.bf16.vlgmr.msra.gmra.mrb[40].mxu0 %v1485_v28  ;;  %1560 = vmatmul.mubr.bf16.vlgmr.msra.gmra.mrb[40].mxu1 %v1485_v28  ;;  %v2166_v28 = vld [vmem:[#allocation6 + $0x38] sm:$0xff]  }
 0x6d6   : > { %1593 = vmatpush1.bf16.msra.mxu0 %v3064_v20  ;;  %1634 = vmatpush1.bf16.msra.mxu1 %v3067_v17 }
 0x6d7   : > { %1594 = vmatprep.subr.bf16.mxu0 %v3070_v61  ;;  %1635 = vmatprep.subr.bf16.mxu1 %v3073_v24  ;;  %v3252_v61 = vld [vmem:[#allocation22_spill] sm:$0xff] }
 0x6d8   : > { %1624 = vmatprep.mubr.bf16.mxu0 %v3240_v46  ;;  %1665 = vmatprep.mubr.bf16.mxu1 %v3240_v46  ;;  %v2263_v46 = vld [vmem:[#allocation3 + $0x84] ss:$16 sps:$4 sm:$0xff]  }
 0x6da   : > { %1595 = vmatpush1.bf16.msra.mxu0 %v3078_v37  ;;  %1636 = vmatpush1.bf16.msra.mxu1 %v3081_v47  ;;  %v3253_v37 = vld [vmem:[#allocation23_spill] sm:$0xff] }
 0x6db   : > { %1596 = vmatprep.subr.bf16.mxu0 %v3084_v38  ;;  %1637 = vmatprep.subr.bf16.mxu1 %v3087_v39 }
 0x6de   : > { %1597 = vmatpush1.bf16.msra.mxu0 %v2257_v59  ;;  %1638 = vmatpush1.bf16.msra.mxu1 %v2258_v0 }
 0x6df   : > { %1598 = vmatprep.subr.bf16.mxu0 %v2259_v29  ;;  %1639 = vmatprep.subr.bf16.mxu1 %v2260_v33  ;;  %v3256_v33 = vld [vmem:[#allocation26_spill] sm:$0xff] }
 0x6e2   : > { %1599 = vmatpush1.bf16.msra.mxu0 %v2261_v34  ;;  %1640 = vmatpush1.bf16.msra.mxu1 %v2262_v18 }
 0x6e3   : > { %1600 = vmatprep.subr.bf16.mxu0 %v2263_v46  ;;  %1641 = vmatprep.subr.bf16.mxu1 %v2264_v22  ;;  %v3257_v22 = vld [vmem:[#allocation27_spill] sm:$0xff] }
 0x6e6   : > { %1601 = vmatpush1.bf16.msra.mxu0 %v2265_v45  ;;  %1642 = vmatpush1.bf16.msra.mxu1 %v2266_v21  ;;  %v3258_v21 = vld [vmem:[#allocation28_spill] sm:$0xff] }
 0x6e7   : > { %1602 = vmatprep.subr.bf16.mxu0 %v2267_v32  ;;  %1643 = vmatprep.subr.bf16.mxu1 %v2268_v48 }
 0x6ea   : > { %1603 = vmatpush1.bf16.msra.mxu0 %v2269_v51  ;;  %1644 = vmatpush1.bf16.msra.mxu1 %v2270_v25 }
 0x6eb   : > { %1604 = vmatprep.subr.bf16.mxu0 %v2271_v26  ;;  %1645 = vmatprep.subr.bf16.mxu1 %v2272_v27 }
 0x6ee   : > { %1605 = vmatpush1.bf16.msra.mxu0 %v2273_v23  ;;  %1646 = vmatpush1.bf16.msra.mxu1 %v2274_v30 }
 0x6ef   : > { %1606 = vmatprep.subr.bf16.mxu0 %v2275_v31  ;;  %1647 = vmatprep.subr.bf16.mxu1 %v2276_v9 }
 0x6f2   : > { %1607 = vmatpush1.bf16.msra.mxu0 %v2277_v12  ;;  %1648 = vmatpush1.bf16.msra.mxu1 %v2278_v60 }
 0x6f3   : > { %1998 = vmatprep.subr.bf16.mxu0 %v3251_v19 }
 0x7a8   : > { %v1520_v20 = vpop.f32.mrb[40].mxu0  ;;  %v1561_v17 = vpop.f32.mrb[40].mxu1 }
 0x7a9   : > { %v1568_v24 = vadd.f32 %v1520_v20, %v3252_v61  ;;  %v1570_v47 = vadd.f32 %v1561_v17, %v3253_v37  ;;  %v1522_v38 = vpop.f32.mrb[41].mxu0  ;;  %v1563_v39 = vpop.f32.mrb[41].mxu1 }
 0x7aa   : > { %v1569_v50 = vadd.f32 %v1522_v38, %v3254_v49  ;;  %v1571_v53 = vadd.f32 %v1563_v39, %v3255_v52  ;;  %v1524_v54 = vpop.f32.mrb[42].mxu0  ;;  %v1565_v55 = vpop.f32.mrb[42].mxu1  ;;  %v1976_v39 = vld [vmem:[%s3205_s5] ss:$0 sm:$0xff] }
 0x7ab   : > { %2227 = vtanh.f32 %v1568_v24  ;;  %v1525_v56 = vpop.f32.mrb[43].mxu0  ;;  %v1566_v57 = vpop.f32.mrb[43].mxu1 }
 0x7ac   : > { %2229 = vtanh.f32 %v1569_v50 }
 0x7ad   : > { %2231 = vtanh.f32 %v1570_v47 }
 0x7ae   : > { %2233 = vtanh.f32 %v1571_v53 }
 0x7b5   : > { %v2228_v62 = vpop.eup %2227 }
 0x7b6   : > { %v1576_v63 = vmul.f32 0.5, %v2228_v62  ;;  %v2230_v2 = vpop.eup %2229 }
 0x7b7   : > { %v1578_v4 = vmul.f32 0.5, %v2230_v2  ;;  %v2232_v5 = vpop.eup %2231 }
 0x7b8   : > { %v1577_v3 = vadd.f32 0.5, %v1576_v63  ;;  %v2234_v13 = vpop.eup %2233 }
 0x7b9   : > { %v1579_v6 = vadd.f32 0.5, %v1578_v4  ;;  %v1580_v14 = vmul.f32 0.5, %v2234_v13 }
 0x7ba   : > { %v1583_v7 = vmul.f32 %v2232_v5, %v1577_v3 }
 0x7bb   : > { %v1582_v10 = vmul.f32 %v1579_v6, %v3119_v42  ;;  %v1581_v15 = vadd.f32 0.5, %v1580_v14  ;;  %v2162_v42 = vld [vmem:[#allocation6 + $0x18] sm:$0xff]  }
 0x7bd   : > { %v1584_v11 = vadd.f32 %v1583_v7, %v1582_v10 }
 0x7bf   : > { %2235 = vtanh.f32 %v1584_v11 }
 0x7c9   : > { %v2236_v16 = vpop.eup %2235 }
 0x7ca   : > { %v1586_v35 = vmul.f32 %v2236_v16, %v1581_v15 }
 0x7cc   : > { %v1591_v36 = vpack.c.bf16 %v1586_v35, %v1586_v35 }
 0x7ce   : > { %1625 = vmatmul.mubr.bf16.vlgmr.msra.gmra.mrb[44].mxu0 %v1591_v36  ;;  %1666 = vmatmul.mubr.bf16.vlgmr.msra.gmra.mrb[44].mxu1 %v1591_v36 }
 0x7cf   : > { %1999 = vmatpush3.bf16.msra.mxu0 %v2159_v41  ;;  %2014 = vmatprep.mubr.msk.bf16.mxu0 %vm2415_vm9, %v3251_v19 }
 0x7d0   : > { %2000 = vmatprep.subr.bf16.mxu0 %v3251_v19 }
 0x7d3   : > { %2001 = vmatpush3.bf16.msra.mxu0 %v2160_v43 }
 0x7d4   : > { %2002 = vmatprep.subr.bf16.mxu0 %v3251_v19 }
 0x7d7   : > { %2003 = vmatpush3.bf16.msra.mxu0 %v2161_v44 }
 0x7d8   : > { %2004 = vmatprep.subr.bf16.mxu0 %v3251_v19 }
 0x7db   : > { %2005 = vmatpush3.bf16.msra.mxu0 %v2162_v42 }
 0x7dc   : > { %2006 = vmatprep.subr.bf16.mxu0 %v3251_v19 }
 0x7df   : > { %2007 = vmatpush3.bf16.msra.mxu0 %v2163_v8 }
 0x7e0   : > { %2008 = vmatprep.subr.bf16.mxu0 %v3251_v19 }
 0x7e3   : > { %2009 = vmatpush3.bf16.msra.mxu0 %v2164_v40 }
 0x7e4   : > { %2010 = vmatprep.subr.bf16.mxu0 %v3251_v19 }
 0x7e7   : > { %2011 = vmatpush3.bf16.msra.mxu0 %v2165_v1 }
 0x7e8   : > { %2012 = vmatprep.subr.bf16.mxu0 %v3251_v19 }
 0x7eb   : > { %2013 = vmatpush3.bf16.msra.mxu0 %v2166_v28 }
 0x8a1   : > { %v1626_v59 = vpop.f32.mrb[44].mxu0  ;;  %v1667_v0 = vpop.f32.mrb[44].mxu1 }
 0x8a2   : > { %v1674_v29 = vadd.f32 %v1626_v59, %v2875_v58  ;;  %v1676_v34 = vadd.f32 %v1667_v0, %v3256_v33  ;;  %v1628_v18 = vpop.f32.mrb[45].mxu0  ;;  %v1669_v46 = vpop.f32.mrb[45].mxu1 }
 0x8a3   : > { %v1675_v45 = vadd.f32 %v1628_v18, %v3257_v22  ;;  %v1677_v32 = vadd.f32 %v1669_v46, %v3258_v21  ;;  %v1630_v48 = vpop.f32.mrb[46].mxu0  ;;  %v1671_v51 = vpop.f32.mrb[46].mxu1 }
 0x8a4   : > { %2237 = vtanh.f32 %v1674_v29  ;;  %v1631_v25 = vpop.f32.mrb[47].mxu0  ;;  %v1672_v26 = vpop.f32.mrb[47].mxu1 }
 0x8a5   : > { %2239 = vtanh.f32 %v1675_v45 }
 0x8a6   : > { %2241 = vtanh.f32 %v1676_v34 }
 0x8a7   : > { %2243 = vtanh.f32 %v1677_v32 }
 0x8ae   : > { %v2238_v27 = vpop.eup %2237 }
 0x8af   : > { %v1682_v23 = vmul.f32 0.5, %v2238_v27  ;;  %v2240_v30 = vpop.eup %2239 }
 0x8b0   : > { %v1684_v58 = vmul.f32 0.5, %v2240_v30  ;;  %v2242_v9 = vpop.eup %2241 }
 0x8b1   : > { %v1683_v31 = vadd.f32 0.5, %v1682_v23  ;;  %v2244_v17 = vpop.eup %2243 }
 0x8b2   : > { %v1685_v12 = vadd.f32 0.5, %v1684_v58  ;;  %v1686_v61 = vmul.f32 0.5, %v2244_v17 }
 0x8b3   : > { %v1689_v60 = vmul.f32 %v2242_v9, %v1683_v31 }
 0x8b4   : > { %v1688_v19 = vmul.f32 %v1685_v12, %v1584_v11  ;;  %v1687_v24 = vadd.f32 0.5, %v1686_v61 }
 0x8b6   : > { %v1690_v20 = vadd.f32 %v1689_v60, %v1688_v19 }
 0x8b8   : > { %2245 = vtanh.f32 %v1690_v20 }
 0x8c2   : > { %v2246_v37 = vpop.eup %2245 }
 0x8c3   : > { %v1692_v47 = vmul.f32 %v2246_v37, %v1687_v24 }
 0x8c5   : > { %v1693_v38 = vpack.c.bf16 %v1692_v47, %v1692_v47 }
 0x8c7   : > { %2015 = vmatmul.mubr.bf16.vlgmr.msra.gmra.mrb[48].mxu0 %v1693_v38 }
 0x99a   : > { %v1799_v49 = vpop.f32.mrb[48].mxu0 }
 0x99b   : > { %v1800_v50 = vadd.f32 %v1976_v39, %v1799_v49  ;;  %v2016_v52 = vpop.f32.mrb[49].mxu0 }
 0x99c   : > { %v1802_v53 = vpop.f32.mrb[50].mxu0 }
 0x99d   : > { %1805 = vst [vmem:[%s275_s12] sm:$0xff] %v1800_v50  ;;  %v2017_v54 = vpop.f32.mrb[51].mxu0 }
 0x99e   : > { %2348 = shalt.err (!%p2345_p11)
}
 0x99f   : > { %s2349_s28 = scalar_lea.hbm %s3158_s16, 128  ;;  %s2353_s10 = scalar_lea.hbm %s3206_s6, 256 }
 0x9a0   : > { %p2350_p13 = scmp.ne.s32.totalorder %s3158_s16, %s2349_s28  ;;  %p2354_p6 = scmp.lt.u32.totalorder %s3158_s16, %s3206_s6 }
 0x9a1   : > { %p2355_p9 = scmp.lt.u32.totalorder %s2353_s10, %s2349_s28  ;;  %p2357_p10 = scmp.lt.u32.totalorder %s2349_s28, %s3158_s16 }
 0x9a2   : > { %p2351_p0 = pnand %p2350_p13, %p3259_p1 }
 0x9a3   : > { %p2356_p12 = por %p2355_p9, %p2354_p6 }
 0x9a4   : > { %p2352_p5 = pneg %p2351_p0 }
 0x9a5   : > { %p2358_p2 = por %p2357_p10, %p2356_p12 }
 0x9a7   : > { %p2359_p3 = pnand %p2358_p2, %p2352_p5 }
 0x9a9   : > { %2362 = shalt.err (!%p2359_p3)
}
 0x9aa   : > { %2026 = dma.vmem_to_hbm [thread:$0]  (%p3259_p1), %s3160_s9, 128, %s3158_s16, %s1807_s18  }
 0x9ab PF: > { %p2043_p4 = scmp.ge.s32.totalorder %s2405_s24, 2  ;;  %s1832_s12 = sand.u32 1, %s2393_s21  }
 0x9ac   : > { %p3260_p7 = scmp.ne.s32.totalorder %s3215_s8, 0  ;;  %s1833_s17 = scalar_lea.sflag [#allocation5], %s1832_s12 }
 0x9ae   : > { %p2036_p8 = pnand %p2043_p4, %p3260_p7 }
 0x9b0   : > { %2388 = dma.done.wait (!%p2036_p8), %s1833_s17, 128  }
 0x9b1   : > { %2390 = vsyncadd (!%p2036_p8), %s1833_s17, 4294967168  ;;  %p18_p11 = scmp.ge.s32.totalorder %s2477_s27, 4   ;;  %s3261_s21 = smov %s2397_s22 }
 0x9b2   : > { %s3262_s22 = smov %s2401_s23  ;;  %s3263_s23 = smov %s2488_s30 }
 0x9b3   : > { %s3264_s24 = smov %s2477_s27  ;;  %20 = sbr.rel (!%p18_p11) target bundleno = 5 (0x5), region = 88 }
 0x9ba   :  { %1838 = vsyncpa [#allocation4], 1 }
 0x9bb   :  { %1840 = vsyncpa [#allocation4 + $0x1], 1 }
 0x9bc   :  { %1841 = vsyncpa [#allocation7], 1 }
 0x9bd   :  { %1842 = vsyncpa [#allocation5], 1 }
 0x9be   :  { %1844 = vsyncpa [#allocation5 + $0x1], 1 }

</bundles_post_ra>
